<compile_context>
chip_gen: v7x
topology: tpu7x:2x2x1
jax: 0.10.0
libtpu: 0.0.40
codegen_flags: <defaults>
</compile_context>

<pallas_src>
import math
import functools

import jax
import jax.numpy as jnp
from jax.experimental import pallas as pl
from jax.experimental.pallas import tpu as pltpu

EPS = 1e-5  # torch.nn.LayerNorm default eps


# ---------------------------------------------------------------- helpers ----
def _layernorm(z, gamma, beta):
    mu = jnp.mean(z, axis=-1, keepdims=True)
    var = jnp.mean((z - mu) ** 2, axis=-1, keepdims=True)
    return (z - mu) * jax.lax.rsqrt(var + EPS) * gamma + beta


def _softmax(s):
    m = jnp.max(s, axis=-1, keepdims=True)
    e = jnp.exp(s - m)
    return e * pl.reciprocal(jnp.sum(e, axis=-1, keepdims=True), approx=True)


def _attend(q, k, v, num_heads):
    # q: (L, D), k/v: (S, D) — already projected. Per-head score / PV on dh slices.
    L, D = q.shape
    dh = D // num_heads
    scale = 1.0 / math.sqrt(dh)
    heads = []
    for h in range(num_heads):
        sl = slice(h * dh, (h + 1) * dh)
        s = jnp.dot(q[:, sl], k[:, sl].T, preferred_element_type=jnp.float32) * scale
        p = _softmax(s)
        heads.append(jnp.dot(p, v[:, sl], preferred_element_type=jnp.float32))
    return jnp.concatenate(heads, axis=-1)  # (L, D)


# ------------------------------------------------------------ fused kernel ----
def _decoder_layer_kernel(
    x_ref, cross_ref,
    wqkv_s_ref, bqkv_s_ref, wo_s_ref, bo_s_ref,
    wq_c_ref, bq_c_ref, wkv_c_ref, bkv_c_ref, wo_c_ref, bo_c_ref,
    w1_ref, b1_ref, w2_ref, b2_ref,
    wblk_ref,
    ln1g_ref, ln1b_ref, ln2g_ref, ln2b_ref,
    ln3g_ref, ln3b_ref, ln4g_ref, ln4b_ref,
    o_ref, *, num_heads,
):
    x = x_ref[...]          # (L, D)
    cross = cross_ref[...]  # (S, D)
    D = x.shape[1]

    # ---- self attention (fused QKV projection) + add & norm1 ----
    qkv = jnp.dot(x, wqkv_s_ref[...], preferred_element_type=jnp.float32) + bqkv_s_ref[...]
    attn = _attend(qkv[:, :D], qkv[:, D:2 * D], qkv[:, 2 * D:], num_heads)
    sa = jnp.dot(attn, wo_s_ref[...], preferred_element_type=jnp.float32) + bo_s_ref[...]
    x = _layernorm(x + sa, ln1g_ref[...], ln1b_ref[...])

    # ---- cross attention (fused KV projection) + add & norm2 ----
    q = jnp.dot(x, wq_c_ref[...], preferred_element_type=jnp.float32) + bq_c_ref[...]
    kv = jnp.dot(cross, wkv_c_ref[...], preferred_element_type=jnp.float32) + bkv_c_ref[...]
    attn = _attend(q, kv[:, :D], kv[:, D:], num_heads)
    ca = jnp.dot(attn, wo_c_ref[...], preferred_element_type=jnp.float32) + bo_c_ref[...]
    x = _layernorm(x + ca, ln2g_ref[...], ln2b_ref[...])

    # ---- FFN: conv1(k=1) -> relu -> conv2(k=1), add & norm3 (dropout = identity) ----
    h = jnp.dot(x, w1_ref[...], preferred_element_type=jnp.float32) + b1_ref[...]
    h = jnp.maximum(h, 0.0)
    y = jnp.dot(h, w2_ref[...], preferred_element_type=jnp.float32) + b2_ref[...]
    x = _layernorm(x + y, ln3g_ref[...], ln3b_ref[...])

    # ---- chunk mixing: block-diag(kron(I_n, W)) @ x  == einsum('ij,bnjd->bnid'), norm4 ----
    xt = jnp.dot(wblk_ref[...], x, preferred_element_type=jnp.float32)
    o_ref[...] = _layernorm(xt, ln4g_ref[...], ln4b_ref[...])


# ---------------------------------------------------------------- wrapper ----
def decoder_layer_forward(x, cross, params, num_heads, c):
    B, L, D = x.shape
    S = cross.shape[1]
    n = L // c

    wq_s, bq_s, wk_s, bk_s, wv_s, bv_s, wo_s, bo_s = params["self_attn"]
    wq_c, bq_c, wk_c, bk_c, wv_c, bv_c, wo_c, bo_c = params["cross_attn"]

    # Fused projection weights (fewer, wider matmuls on the MXU).
    wqkv_s = jnp.concatenate([wq_s, wk_s, wv_s], axis=1)   # (D, 3D)
    bqkv_s = jnp.concatenate([bq_s, bk_s, bv_s], axis=1)   # (1, 3D)
    wkv_c = jnp.concatenate([wk_c, wv_c], axis=1)          # (D, 2D)
    bkv_c = jnp.concatenate([bk_c, bv_c], axis=1)          # (1, 2D)
    # Block-diagonal chunk-mixing matrix: one aligned (L, L) @ (L, D) matmul.
    wblk = jnp.kron(jnp.eye(n, dtype=jnp.float32), params["W"])  # (L, L)

    seq = lambda length: pl.BlockSpec((None, length, D), lambda b: (b, 0, 0))
    full = lambda a: pl.BlockSpec(a.shape, lambda b: (0, 0))

    inputs = (
        x, cross,
        wqkv_s, bqkv_s, wo_s, bo_s,
        wq_c, bq_c, wkv_c, bkv_c, wo_c, bo_c,
        params["w1"], params["b1"], params["w2"], params["b2"],
        wblk,
        params["ln1_g"], params["ln1_b"], params["ln2_g"], params["ln2_b"],
        params["ln3_g"], params["ln3_b"], params["ln4_g"], params["ln4_b"],
    )
    in_specs = [seq(L), seq(S)] + [full(a) for a in inputs[2:]]

    return pl.pallas_call(
        functools.partial(_decoder_layer_kernel, num_heads=num_heads),
        out_shape=jax.ShapeDtypeStruct((B, L, D), jnp.float32),
        grid=(B,),
        in_specs=in_specs,
        out_specs=seq(L),
        compiler_params=pltpu.CompilerParams(
            dimension_semantics=("parallel",)),  # megacore sharding over batch on v7x
    )(*inputs)


# --------------------------------------------------------- pure-JAX reference ----
def _ref_mha(x, mem, p, num_heads):
    wq, bq, wk, bk, wv, bv, wo, bo = p
    B, L, D = x.shape
    S = mem.shape[1]
    dh = D // num_heads
    q = (x @ wq + bq).reshape(B, L, num_heads, dh)
    k = (mem @ wk + bk).reshape(B, S, num_heads, dh)
    v = (mem @ wv + bv).reshape(B, S, num_heads, dh)
    s = jnp.einsum("blhd,bshd->bhls", q, k) / math.sqrt(dh)
    a = jax.nn.softmax(s, axis=-1)
    o = jnp.einsum("bhls,bshd->blhd", a, v).reshape(B, L, D)
    return o @ wo + bo


def _ref_forward(x, cross, params, num_heads, c):
    x = _layernorm(x + _ref_mha(x, x, params["self_attn"], num_heads),
                   params["ln1_g"], params["ln1_b"])
    x = _layernorm(x + _ref_mha(x, cross, params["cross_attn"], num_heads),
                   params["ln2_g"], params["ln2_b"])
    y = jnp.maximum(x @ params["w1"] + params["b1"], 0.0) @ params["w2"] + params["b2"]
    x = _layernorm(x + y, params["ln3_g"], params["ln3_b"])
    B, L, D = x.shape
    xr = x.reshape(B, L // c, c, D)
    xt = jnp.einsum("ij,bnjd->bnid", params["W"], xr).reshape(B, L, D)
    return _layernorm(xt, params["ln4_g"], params["ln4_b"])


# ---------------------------------------------------------------- params ----
def init_params(key, D, d_ff, c):
    def lin(k, din, dout):
        kw, kb = jax.random.split(k)
        bound = 1.0 / math.sqrt(din)
        w = jax.random.uniform(kw, (din, dout), jnp.float32, -bound, bound)
        b = jax.random.uniform(kb, (1, dout), jnp.float32, -bound, bound)
        return w, b

    ks = iter(jax.random.split(key, 16))
    params = {}
    for name in ("self_attn", "cross_attn"):
        wq, bq = lin(next(ks), D, D)
        wk, bk = lin(next(ks), D, D)
        wv, bv = lin(next(ks), D, D)
        wo, bo = lin(next(ks), D, D)
        params[name] = (wq, bq, wk, bk, wv, bv, wo, bo)
    params["w1"], params["b1"] = lin(next(ks), D, d_ff)    # conv1 (kernel_size=1)
    params["w2"], params["b2"] = lin(next(ks), d_ff, D)    # conv2 (kernel_size=1)
    xav = math.sqrt(6.0 / (c + c))                          # xavier_uniform_ for W (7x7)
    params["W"] = jax.random.uniform(next(ks), (c, c), jnp.float32, -xav, xav)
    for i in (1, 2, 3, 4):                                  # LayerNorm affine defaults
        params[f"ln{i}_g"] = jnp.ones((1, D), jnp.float32)
        params[f"ln{i}_b"] = jnp.zeros((1, D), jnp.float32)
    return params


# ------------------------------------------------------------------- main ----
if __name__ == "__main__":
    B, L, S, D, H, C = 2, 14, 12, 32, 4, 7     # L must be divisible by c=7
    d_ff = 4 * D

    key = jax.random.PRNGKey(0)
    kx, kc, kp = jax.random.split(key, 3)
    x = jax.random.normal(kx, (B, L, D), jnp.float32)
    cross = jax.random.normal(kc, (B, S, D), jnp.float32)
    params = init_params(kp, D, d_ff, C)

    fwd = jax.jit(decoder_layer_forward, static_argnums=(3, 4))
    out = fwd(x, cross, params, H, C)
    jax.block_until_ready(out)

    # Reference at full f32 precision; kernel uses MXU-default precision (bf16-class
    # passes with f32 accumulate), hence the slightly relaxed tolerance.
    with jax.default_matmul_precision("highest"):
        ref = _ref_forward(x, cross, params, H, C)
    assert out.shape == (B, L, D)
    err = float(jnp.max(jnp.abs(out - ref)))
    assert jnp.allclose(out, ref, atol=2e-2, rtol=2e-2), err

    print("KERNEL_OK")
</pallas_src>

<mosaic_0001>
module attributes {stable_mosaic.version = 11 : i64} {
  func.func @_decoder_layer_kernel(%arg0: i32, %arg1: memref<1x14x32xf32, #tpu.memory_space<vmem>>, %arg2: memref<1x12x32xf32, #tpu.memory_space<vmem>>, %arg3: memref<32x96xf32, #tpu.memory_space<vmem>>, %arg4: memref<1x96xf32, #tpu.memory_space<vmem>>, %arg5: memref<32x32xf32, #tpu.memory_space<vmem>>, %arg6: memref<1x32xf32, #tpu.memory_space<vmem>>, %arg7: memref<32x32xf32, #tpu.memory_space<vmem>>, %arg8: memref<1x32xf32, #tpu.memory_space<vmem>>, %arg9: memref<32x64xf32, #tpu.memory_space<vmem>>, %arg10: memref<1x64xf32, #tpu.memory_space<vmem>>, %arg11: memref<32x32xf32, #tpu.memory_space<vmem>>, %arg12: memref<1x32xf32, #tpu.memory_space<vmem>>, %arg13: memref<32x128xf32, #tpu.memory_space<vmem>>, %arg14: memref<1x128xf32, #tpu.memory_space<vmem>>, %arg15: memref<128x32xf32, #tpu.memory_space<vmem>>, %arg16: memref<1x32xf32, #tpu.memory_space<vmem>>, %arg17: memref<14x14xf32, #tpu.memory_space<vmem>>, %arg18: memref<1x32xf32, #tpu.memory_space<vmem>>, %arg19: memref<1x32xf32, #tpu.memory_space<vmem>>, %arg20: memref<1x32xf32, #tpu.memory_space<vmem>>, %arg21: memref<1x32xf32, #tpu.memory_space<vmem>>, %arg22: memref<1x32xf32, #tpu.memory_space<vmem>>, %arg23: memref<1x32xf32, #tpu.memory_space<vmem>>, %arg24: memref<1x32xf32, #tpu.memory_space<vmem>>, %arg25: memref<1x32xf32, #tpu.memory_space<vmem>>, %arg26: memref<1x14x32xf32, #tpu.memory_space<vmem>>) attributes {dimension_semantics = [#tpu.dimension_semantics<parallel>], iteration_bounds = array<i64: 2>, scalar_prefetch = 0 : i64, scratch_operands = 0 : i64, tpu.core_type = #tpu.core_type<tc>, window_params = [{transform_indices = @transform_0, window_bounds = array<i64: 1, 14, 32>}, {transform_indices = @transform_1, window_bounds = array<i64: 1, 12, 32>}, {pipeline_mode = #tpu.pipeline_mode<synchronous>, transform_indices = @transform_2, window_bounds = array<i64: 32, 96>}, {pipeline_mode = #tpu.pipeline_mode<synchronous>, transform_indices = @transform_3, window_bounds = array<i64: 1, 96>}, {pipeline_mode = #tpu.pipeline_mode<synchronous>, transform_indices = @transform_4, window_bounds = array<i64: 32, 32>}, {pipeline_mode = #tpu.pipeline_mode<synchronous>, transform_indices = @transform_5, window_bounds = array<i64: 1, 32>}, {pipeline_mode = #tpu.pipeline_mode<synchronous>, transform_indices = @transform_6, window_bounds = array<i64: 32, 32>}, {pipeline_mode = #tpu.pipeline_mode<synchronous>, transform_indices = @transform_7, window_bounds = array<i64: 1, 32>}, {pipeline_mode = #tpu.pipeline_mode<synchronous>, transform_indices = @transform_8, window_bounds = array<i64: 32, 64>}, {pipeline_mode = #tpu.pipeline_mode<synchronous>, transform_indices = @transform_9, window_bounds = array<i64: 1, 64>}, {pipeline_mode = #tpu.pipeline_mode<synchronous>, transform_indices = @transform_10, window_bounds = array<i64: 32, 32>}, {pipeline_mode = #tpu.pipeline_mode<synchronous>, transform_indices = @transform_11, window_bounds = array<i64: 1, 32>}, {pipeline_mode = #tpu.pipeline_mode<synchronous>, transform_indices = @transform_12, window_bounds = array<i64: 32, 128>}, {pipeline_mode = #tpu.pipeline_mode<synchronous>, transform_indices = @transform_13, window_bounds = array<i64: 1, 128>}, {pipeline_mode = #tpu.pipeline_mode<synchronous>, transform_indices = @transform_14, window_bounds = array<i64: 128, 32>}, {pipeline_mode = #tpu.pipeline_mode<synchronous>, transform_indices = @transform_15, window_bounds = array<i64: 1, 32>}, {pipeline_mode = #tpu.pipeline_mode<synchronous>, transform_indices = @transform_16, window_bounds = array<i64: 14, 14>}, {pipeline_mode = #tpu.pipeline_mode<synchronous>, transform_indices = @transform_17, window_bounds = array<i64: 1, 32>}, {pipeline_mode = #tpu.pipeline_mode<synchronous>, transform_indices = @transform_18, window_bounds = array<i64: 1, 32>}, {pipeline_mode = #tpu.pipeline_mode<synchronous>, transform_indices = @transform_19, window_bounds = array<i64: 1, 32>}, {pipeline_mode = #tpu.pipeline_mode<synchronous>, transform_indices = @transform_20, window_bounds = array<i64: 1, 32>}, {pipeline_mode = #tpu.pipeline_mode<synchronous>, transform_indices = @transform_21, window_bounds = array<i64: 1, 32>}, {pipeline_mode = #tpu.pipeline_mode<synchronous>, transform_indices = @transform_22, window_bounds = array<i64: 1, 32>}, {pipeline_mode = #tpu.pipeline_mode<synchronous>, transform_indices = @transform_23, window_bounds = array<i64: 1, 32>}, {pipeline_mode = #tpu.pipeline_mode<synchronous>, transform_indices = @transform_24, window_bounds = array<i64: 1, 32>}, {transform_indices = @transform_25, window_bounds = array<i64: 1, 14, 32>}]} {
    %c0 = arith.constant 0 : index
    %c0_0 = arith.constant 0 : index
    %c0_1 = arith.constant 0 : index
    %0 = vector.load %arg1[%c0, %c0_0, %c0_1] : memref<1x14x32xf32, #tpu.memory_space<vmem>>, vector<1x14x32xf32>
    %1 = vector.shape_cast %0 : vector<1x14x32xf32> to vector<14x32xf32>
    %c0_2 = arith.constant 0 : index
    %c0_3 = arith.constant 0 : index
    %c0_4 = arith.constant 0 : index
    %2 = vector.load %arg2[%c0_2, %c0_3, %c0_4] : memref<1x12x32xf32, #tpu.memory_space<vmem>>, vector<1x12x32xf32>
    %3 = vector.shape_cast %2 : vector<1x12x32xf32> to vector<12x32xf32>
    %c0_5 = arith.constant 0 : index
    %c0_6 = arith.constant 0 : index
    %4 = vector.load %arg3[%c0_5, %c0_6] : memref<32x96xf32, #tpu.memory_space<vmem>>, vector<32x96xf32>
    %cst = arith.constant dense<0.000000e+00> : vector<14x96xf32>
    %5 = tpu.matmul %1, %4, %cst {dimension_numbers = #tpu.dot_dimension_numbers<[1], [0], [0], [1], [0, 0, 1, 1], [], []>} : vector<14x32xf32>, vector<32x96xf32>, vector<14x96xf32> -> vector<14x96xf32>
    %c0_7 = arith.constant 0 : index
    %c0_8 = arith.constant 0 : index
    %6 = vector.load %arg4[%c0_7, %c0_8] : memref<1x96xf32, #tpu.memory_space<vmem>>, vector<1x96xf32>
    %7 = vector.broadcast %6 : vector<1x96xf32> to vector<14x96xf32>
    %8 = arith.addf %5, %7 : vector<14x96xf32>
    %9 = vector.extract_strided_slice %8 {offsets = [0, 0], sizes = [14, 32], strides = [1, 1]} : vector<14x96xf32> to vector<14x32xf32>
    %10 = vector.extract_strided_slice %8 {offsets = [0, 32], sizes = [14, 32], strides = [1, 1]} : vector<14x96xf32> to vector<14x32xf32>
    %11 = vector.extract_strided_slice %8 {offsets = [0, 64], sizes = [14, 32], strides = [1, 1]} : vector<14x96xf32> to vector<14x32xf32>
    %12 = vector.extract_strided_slice %9 {offsets = [0, 0], sizes = [14, 8], strides = [1, 1]} : vector<14x32xf32> to vector<14x8xf32>
    %13 = vector.extract_strided_slice %10 {offsets = [0, 0], sizes = [14, 8], strides = [1, 1]} : vector<14x32xf32> to vector<14x8xf32>
    %14 = tpu.transpose %13, [1, 0] : vector<14x8xf32> -> vector<8x14xf32>
    %cst_9 = arith.constant dense<0.000000e+00> : vector<14x14xf32>
    %15 = tpu.matmul %12, %14, %cst_9 {dimension_numbers = #tpu.dot_dimension_numbers<[1], [0], [0], [1], [0, 0, 1, 1], [], []>} : vector<14x8xf32>, vector<8x14xf32>, vector<14x14xf32> -> vector<14x14xf32>
    %cst_10 = arith.constant 0.353553385 : f32
    %16 = vector.broadcast %cst_10 : f32 to vector<14x14xf32>
    %17 = arith.mulf %15, %16 : vector<14x14xf32>
    %cst_11 = arith.constant dense<0xFF800000> : vector<14xf32>
    %18 = vector.multi_reduction <maximumf>, %17, %cst_11 [1] : vector<14x14xf32> to vector<14xf32>
    %19 = vector.shape_cast %18 : vector<14xf32> to vector<14x1xf32>
    %20 = vector.broadcast %19 : vector<14x1xf32> to vector<14x14xf32>
    %21 = arith.subf %17, %20 : vector<14x14xf32>
    %22 = math.exp %21 : vector<14x14xf32>
    %cst_12 = arith.constant dense<0.000000e+00> : vector<14xf32>
    %23 = vector.multi_reduction <add>, %22, %cst_12 [1] : vector<14x14xf32> to vector<14xf32>
    %24 = vector.shape_cast %23 : vector<14xf32> to vector<14x1xf32>
    %25 = tpu.reciprocal %24 {approx = true} : vector<14x1xf32> -> vector<14x1xf32>
    %26 = vector.broadcast %25 : vector<14x1xf32> to vector<14x14xf32>
    %27 = arith.mulf %22, %26 : vector<14x14xf32>
    %28 = vector.extract_strided_slice %11 {offsets = [0, 0], sizes = [14, 8], strides = [1, 1]} : vector<14x32xf32> to vector<14x8xf32>
    %cst_13 = arith.constant dense<0.000000e+00> : vector<14x8xf32>
    %29 = tpu.matmul %27, %28, %cst_13 {dimension_numbers = #tpu.dot_dimension_numbers<[1], [0], [0], [1], [0, 0, 1, 1], [], []>} : vector<14x14xf32>, vector<14x8xf32>, vector<14x8xf32> -> vector<14x8xf32>
    %30 = vector.extract_strided_slice %9 {offsets = [0, 8], sizes = [14, 8], strides = [1, 1]} : vector<14x32xf32> to vector<14x8xf32>
    %31 = vector.extract_strided_slice %10 {offsets = [0, 8], sizes = [14, 8], strides = [1, 1]} : vector<14x32xf32> to vector<14x8xf32>
    %32 = tpu.transpose %31, [1, 0] : vector<14x8xf32> -> vector<8x14xf32>
    %cst_14 = arith.constant dense<0.000000e+00> : vector<14x14xf32>
    %33 = tpu.matmul %30, %32, %cst_14 {dimension_numbers = #tpu.dot_dimension_numbers<[1], [0], [0], [1], [0, 0, 1, 1], [], []>} : vector<14x8xf32>, vector<8x14xf32>, vector<14x14xf32> -> vector<14x14xf32>
    %cst_15 = arith.constant 0.353553385 : f32
    %34 = vector.broadcast %cst_15 : f32 to vector<14x14xf32>
    %35 = arith.mulf %33, %34 : vector<14x14xf32>
    %cst_16 = arith.constant dense<0xFF800000> : vector<14xf32>
    %36 = vector.multi_reduction <maximumf>, %35, %cst_16 [1] : vector<14x14xf32> to vector<14xf32>
    %37 = vector.shape_cast %36 : vector<14xf32> to vector<14x1xf32>
    %38 = vector.broadcast %37 : vector<14x1xf32> to vector<14x14xf32>
    %39 = arith.subf %35, %38 : vector<14x14xf32>
    %40 = math.exp %39 : vector<14x14xf32>
    %cst_17 = arith.constant dense<0.000000e+00> : vector<14xf32>
    %41 = vector.multi_reduction <add>, %40, %cst_17 [1] : vector<14x14xf32> to vector<14xf32>
    %42 = vector.shape_cast %41 : vector<14xf32> to vector<14x1xf32>
    %43 = tpu.reciprocal %42 {approx = true} : vector<14x1xf32> -> vector<14x1xf32>
    %44 = vector.broadcast %43 : vector<14x1xf32> to vector<14x14xf32>
    %45 = arith.mulf %40, %44 : vector<14x14xf32>
    %46 = vector.extract_strided_slice %11 {offsets = [0, 8], sizes = [14, 8], strides = [1, 1]} : vector<14x32xf32> to vector<14x8xf32>
    %cst_18 = arith.constant dense<0.000000e+00> : vector<14x8xf32>
    %47 = tpu.matmul %45, %46, %cst_18 {dimension_numbers = #tpu.dot_dimension_numbers<[1], [0], [0], [1], [0, 0, 1, 1], [], []>} : vector<14x14xf32>, vector<14x8xf32>, vector<14x8xf32> -> vector<14x8xf32>
    %48 = vector.extract_strided_slice %9 {offsets = [0, 16], sizes = [14, 8], strides = [1, 1]} : vector<14x32xf32> to vector<14x8xf32>
    %49 = vector.extract_strided_slice %10 {offsets = [0, 16], sizes = [14, 8], strides = [1, 1]} : vector<14x32xf32> to vector<14x8xf32>
    %50 = tpu.transpose %49, [1, 0] : vector<14x8xf32> -> vector<8x14xf32>
    %cst_19 = arith.constant dense<0.000000e+00> : vector<14x14xf32>
    %51 = tpu.matmul %48, %50, %cst_19 {dimension_numbers = #tpu.dot_dimension_numbers<[1], [0], [0], [1], [0, 0, 1, 1], [], []>} : vector<14x8xf32>, vector<8x14xf32>, vector<14x14xf32> -> vector<14x14xf32>
    %cst_20 = arith.constant 0.353553385 : f32
    %52 = vector.broadcast %cst_20 : f32 to vector<14x14xf32>
    %53 = arith.mulf %51, %52 : vector<14x14xf32>
    %cst_21 = arith.constant dense<0xFF800000> : vector<14xf32>
    %54 = vector.multi_reduction <maximumf>, %53, %cst_21 [1] : vector<14x14xf32> to vector<14xf32>
    %55 = vector.shape_cast %54 : vector<14xf32> to vector<14x1xf32>
    %56 = vector.broadcast %55 : vector<14x1xf32> to vector<14x14xf32>
    %57 = arith.subf %53, %56 : vector<14x14xf32>
    %58 = math.exp %57 : vector<14x14xf32>
    %cst_22 = arith.constant dense<0.000000e+00> : vector<14xf32>
    %59 = vector.multi_reduction <add>, %58, %cst_22 [1] : vector<14x14xf32> to vector<14xf32>
    %60 = vector.shape_cast %59 : vector<14xf32> to vector<14x1xf32>
    %61 = tpu.reciprocal %60 {approx = true} : vector<14x1xf32> -> vector<14x1xf32>
    %62 = vector.broadcast %61 : vector<14x1xf32> to vector<14x14xf32>
    %63 = arith.mulf %58, %62 : vector<14x14xf32>
    %64 = vector.extract_strided_slice %11 {offsets = [0, 16], sizes = [14, 8], strides = [1, 1]} : vector<14x32xf32> to vector<14x8xf32>
    %cst_23 = arith.constant dense<0.000000e+00> : vector<14x8xf32>
    %65 = tpu.matmul %63, %64, %cst_23 {dimension_numbers = #tpu.dot_dimension_numbers<[1], [0], [0], [1], [0, 0, 1, 1], [], []>} : vector<14x14xf32>, vector<14x8xf32>, vector<14x8xf32> -> vector<14x8xf32>
    %66 = vector.extract_strided_slice %9 {offsets = [0, 24], sizes = [14, 8], strides = [1, 1]} : vector<14x32xf32> to vector<14x8xf32>
    %67 = vector.extract_strided_slice %10 {offsets = [0, 24], sizes = [14, 8], strides = [1, 1]} : vector<14x32xf32> to vector<14x8xf32>
    %68 = tpu.transpose %67, [1, 0] : vector<14x8xf32> -> vector<8x14xf32>
    %cst_24 = arith.constant dense<0.000000e+00> : vector<14x14xf32>
    %69 = tpu.matmul %66, %68, %cst_24 {dimension_numbers = #tpu.dot_dimension_numbers<[1], [0], [0], [1], [0, 0, 1, 1], [], []>} : vector<14x8xf32>, vector<8x14xf32>, vector<14x14xf32> -> vector<14x14xf32>
    %cst_25 = arith.constant 0.353553385 : f32
    %70 = vector.broadcast %cst_25 : f32 to vector<14x14xf32>
    %71 = arith.mulf %69, %70 : vector<14x14xf32>
    %cst_26 = arith.constant dense<0xFF800000> : vector<14xf32>
    %72 = vector.multi_reduction <maximumf>, %71, %cst_26 [1] : vector<14x14xf32> to vector<14xf32>
    %73 = vector.shape_cast %72 : vector<14xf32> to vector<14x1xf32>
    %74 = vector.broadcast %73 : vector<14x1xf32> to vector<14x14xf32>
    %75 = arith.subf %71, %74 : vector<14x14xf32>
    %76 = math.exp %75 : vector<14x14xf32>
    %cst_27 = arith.constant dense<0.000000e+00> : vector<14xf32>
    %77 = vector.multi_reduction <add>, %76, %cst_27 [1] : vector<14x14xf32> to vector<14xf32>
    %78 = vector.shape_cast %77 : vector<14xf32> to vector<14x1xf32>
    %79 = tpu.reciprocal %78 {approx = true} : vector<14x1xf32> -> vector<14x1xf32>
    %80 = vector.broadcast %79 : vector<14x1xf32> to vector<14x14xf32>
    %81 = arith.mulf %76, %80 : vector<14x14xf32>
    %82 = vector.extract_strided_slice %11 {offsets = [0, 24], sizes = [14, 8], strides = [1, 1]} : vector<14x32xf32> to vector<14x8xf32>
    %cst_28 = arith.constant dense<0.000000e+00> : vector<14x8xf32>
    %83 = tpu.matmul %81, %82, %cst_28 {dimension_numbers = #tpu.dot_dimension_numbers<[1], [0], [0], [1], [0, 0, 1, 1], [], []>} : vector<14x14xf32>, vector<14x8xf32>, vector<14x8xf32> -> vector<14x8xf32>
    %84 = tpu.concatenate %29, %47, %65, %83 in 1 : vector<14x8xf32>, vector<14x8xf32>, vector<14x8xf32>, vector<14x8xf32> -> vector<14x32xf32>
    %c0_29 = arith.constant 0 : index
    %c0_30 = arith.constant 0 : index
    %85 = vector.load %arg5[%c0_29, %c0_30] : memref<32x32xf32, #tpu.memory_space<vmem>>, vector<32x32xf32>
    %cst_31 = arith.constant dense<0.000000e+00> : vector<14x32xf32>
    %86 = tpu.matmul %84, %85, %cst_31 {dimension_numbers = #tpu.dot_dimension_numbers<[1], [0], [0], [1], [0, 0, 1, 1], [], []>} : vector<14x32xf32>, vector<32x32xf32>, vector<14x32xf32> -> vector<14x32xf32>
    %c0_32 = arith.constant 0 : index
    %c0_33 = arith.constant 0 : index
    %87 = vector.load %arg6[%c0_32, %c0_33] : memref<1x32xf32, #tpu.memory_space<vmem>>, vector<1x32xf32>
    %88 = vector.broadcast %87 : vector<1x32xf32> to vector<14x32xf32>
    %89 = arith.addf %86, %88 : vector<14x32xf32>
    %90 = arith.addf %1, %89 : vector<14x32xf32>
    %c0_34 = arith.constant 0 : index
    %c0_35 = arith.constant 0 : index
    %91 = vector.load %arg18[%c0_34, %c0_35] : memref<1x32xf32, #tpu.memory_space<vmem>>, vector<1x32xf32>
    %c0_36 = arith.constant 0 : index
    %c0_37 = arith.constant 0 : index
    %92 = vector.load %arg19[%c0_36, %c0_37] : memref<1x32xf32, #tpu.memory_space<vmem>>, vector<1x32xf32>
    %cst_38 = arith.constant dense<0.000000e+00> : vector<14xf32>
    %93 = vector.multi_reduction <add>, %90, %cst_38 [1] : vector<14x32xf32> to vector<14xf32>
    %94 = vector.shape_cast %93 : vector<14xf32> to vector<14x1xf32>
    %cst_39 = arith.constant 3.200000e+01 : f32
    %95 = vector.broadcast %cst_39 : f32 to vector<14x1xf32>
    %96 = arith.divf %94, %95 : vector<14x1xf32>
    %97 = vector.broadcast %96 : vector<14x1xf32> to vector<14x32xf32>
    %98 = arith.subf %90, %97 : vector<14x32xf32>
    %99 = arith.mulf %98, %98 : vector<14x32xf32>
    %cst_40 = arith.constant dense<0.000000e+00> : vector<14xf32>
    %100 = vector.multi_reduction <add>, %99, %cst_40 [1] : vector<14x32xf32> to vector<14xf32>
    %101 = vector.shape_cast %100 : vector<14xf32> to vector<14x1xf32>
    %cst_41 = arith.constant 3.200000e+01 : f32
    %102 = vector.broadcast %cst_41 : f32 to vector<14x1xf32>
    %103 = arith.divf %101, %102 : vector<14x1xf32>
    %104 = vector.broadcast %96 : vector<14x1xf32> to vector<14x32xf32>
    %105 = arith.subf %90, %104 : vector<14x32xf32>
    %cst_42 = arith.constant 9.99999974E-6 : f32
    %106 = vector.broadcast %cst_42 : f32 to vector<14x1xf32>
    %107 = arith.addf %103, %106 : vector<14x1xf32>
    %108 = math.rsqrt %107 : vector<14x1xf32>
    %109 = vector.broadcast %108 : vector<14x1xf32> to vector<14x32xf32>
    %110 = arith.mulf %105, %109 : vector<14x32xf32>
    %111 = vector.broadcast %91 : vector<1x32xf32> to vector<14x32xf32>
    %112 = arith.mulf %110, %111 : vector<14x32xf32>
    %113 = vector.broadcast %92 : vector<1x32xf32> to vector<14x32xf32>
    %114 = arith.addf %112, %113 : vector<14x32xf32>
    %c0_43 = arith.constant 0 : index
    %c0_44 = arith.constant 0 : index
    %115 = vector.load %arg7[%c0_43, %c0_44] : memref<32x32xf32, #tpu.memory_space<vmem>>, vector<32x32xf32>
    %cst_45 = arith.constant dense<0.000000e+00> : vector<14x32xf32>
    %116 = tpu.matmul %114, %115, %cst_45 {dimension_numbers = #tpu.dot_dimension_numbers<[1], [0], [0], [1], [0, 0, 1, 1], [], []>} : vector<14x32xf32>, vector<32x32xf32>, vector<14x32xf32> -> vector<14x32xf32>
    %c0_46 = arith.constant 0 : index
    %c0_47 = arith.constant 0 : index
    %117 = vector.load %arg8[%c0_46, %c0_47] : memref<1x32xf32, #tpu.memory_space<vmem>>, vector<1x32xf32>
    %118 = vector.broadcast %117 : vector<1x32xf32> to vector<14x32xf32>
    %119 = arith.addf %116, %118 : vector<14x32xf32>
    %c0_48 = arith.constant 0 : index
    %c0_49 = arith.constant 0 : index
    %120 = vector.load %arg9[%c0_48, %c0_49] : memref<32x64xf32, #tpu.memory_space<vmem>>, vector<32x64xf32>
    %cst_50 = arith.constant dense<0.000000e+00> : vector<12x64xf32>
    %121 = tpu.matmul %3, %120, %cst_50 {dimension_numbers = #tpu.dot_dimension_numbers<[1], [0], [0], [1], [0, 0, 1, 1], [], []>} : vector<12x32xf32>, vector<32x64xf32>, vector<12x64xf32> -> vector<12x64xf32>
    %c0_51 = arith.constant 0 : index
    %c0_52 = arith.constant 0 : index
    %122 = vector.load %arg10[%c0_51, %c0_52] : memref<1x64xf32, #tpu.memory_space<vmem>>, vector<1x64xf32>
    %123 = vector.broadcast %122 : vector<1x64xf32> to vector<12x64xf32>
    %124 = arith.addf %121, %123 : vector<12x64xf32>
    %125 = vector.extract_strided_slice %124 {offsets = [0, 0], sizes = [12, 32], strides = [1, 1]} : vector<12x64xf32> to vector<12x32xf32>
    %126 = vector.extract_strided_slice %124 {offsets = [0, 32], sizes = [12, 32], strides = [1, 1]} : vector<12x64xf32> to vector<12x32xf32>
    %127 = vector.extract_strided_slice %119 {offsets = [0, 0], sizes = [14, 8], strides = [1, 1]} : vector<14x32xf32> to vector<14x8xf32>
    %128 = vector.extract_strided_slice %125 {offsets = [0, 0], sizes = [12, 8], strides = [1, 1]} : vector<12x32xf32> to vector<12x8xf32>
    %129 = tpu.transpose %128, [1, 0] : vector<12x8xf32> -> vector<8x12xf32>
    %cst_53 = arith.constant dense<0.000000e+00> : vector<14x12xf32>
    %130 = tpu.matmul %127, %129, %cst_53 {dimension_numbers = #tpu.dot_dimension_numbers<[1], [0], [0], [1], [0, 0, 1, 1], [], []>} : vector<14x8xf32>, vector<8x12xf32>, vector<14x12xf32> -> vector<14x12xf32>
    %cst_54 = arith.constant 0.353553385 : f32
    %131 = vector.broadcast %cst_54 : f32 to vector<14x12xf32>
    %132 = arith.mulf %130, %131 : vector<14x12xf32>
    %cst_55 = arith.constant dense<0xFF800000> : vector<14xf32>
    %133 = vector.multi_reduction <maximumf>, %132, %cst_55 [1] : vector<14x12xf32> to vector<14xf32>
    %134 = vector.shape_cast %133 : vector<14xf32> to vector<14x1xf32>
    %135 = vector.broadcast %134 : vector<14x1xf32> to vector<14x12xf32>
    %136 = arith.subf %132, %135 : vector<14x12xf32>
    %137 = math.exp %136 : vector<14x12xf32>
    %cst_56 = arith.constant dense<0.000000e+00> : vector<14xf32>
    %138 = vector.multi_reduction <add>, %137, %cst_56 [1] : vector<14x12xf32> to vector<14xf32>
    %139 = vector.shape_cast %138 : vector<14xf32> to vector<14x1xf32>
    %140 = tpu.reciprocal %139 {approx = true} : vector<14x1xf32> -> vector<14x1xf32>
    %141 = vector.broadcast %140 : vector<14x1xf32> to vector<14x12xf32>
    %142 = arith.mulf %137, %141 : vector<14x12xf32>
    %143 = vector.extract_strided_slice %126 {offsets = [0, 0], sizes = [12, 8], strides = [1, 1]} : vector<12x32xf32> to vector<12x8xf32>
    %cst_57 = arith.constant dense<0.000000e+00> : vector<14x8xf32>
    %144 = tpu.matmul %142, %143, %cst_57 {dimension_numbers = #tpu.dot_dimension_numbers<[1], [0], [0], [1], [0, 0, 1, 1], [], []>} : vector<14x12xf32>, vector<12x8xf32>, vector<14x8xf32> -> vector<14x8xf32>
    %145 = vector.extract_strided_slice %119 {offsets = [0, 8], sizes = [14, 8], strides = [1, 1]} : vector<14x32xf32> to vector<14x8xf32>
    %146 = vector.extract_strided_slice %125 {offsets = [0, 8], sizes = [12, 8], strides = [1, 1]} : vector<12x32xf32> to vector<12x8xf32>
    %147 = tpu.transpose %146, [1, 0] : vector<12x8xf32> -> vector<8x12xf32>
    %cst_58 = arith.constant dense<0.000000e+00> : vector<14x12xf32>
    %148 = tpu.matmul %145, %147, %cst_58 {dimension_numbers = #tpu.dot_dimension_numbers<[1], [0], [0], [1], [0, 0, 1, 1], [], []>} : vector<14x8xf32>, vector<8x12xf32>, vector<14x12xf32> -> vector<14x12xf32>
    %cst_59 = arith.constant 0.353553385 : f32
    %149 = vector.broadcast %cst_59 : f32 to vector<14x12xf32>
    %150 = arith.mulf %148, %149 : vector<14x12xf32>
    %cst_60 = arith.constant dense<0xFF800000> : vector<14xf32>
    %151 = vector.multi_reduction <maximumf>, %150, %cst_60 [1] : vector<14x12xf32> to vector<14xf32>
    %152 = vector.shape_cast %151 : vector<14xf32> to vector<14x1xf32>
    %153 = vector.broadcast %152 : vector<14x1xf32> to vector<14x12xf32>
    %154 = arith.subf %150, %153 : vector<14x12xf32>
    %155 = math.exp %154 : vector<14x12xf32>
    %cst_61 = arith.constant dense<0.000000e+00> : vector<14xf32>
    %156 = vector.multi_reduction <add>, %155, %cst_61 [1] : vector<14x12xf32> to vector<14xf32>
    %157 = vector.shape_cast %156 : vector<14xf32> to vector<14x1xf32>
    %158 = tpu.reciprocal %157 {approx = true} : vector<14x1xf32> -> vector<14x1xf32>
    %159 = vector.broadcast %158 : vector<14x1xf32> to vector<14x12xf32>
    %160 = arith.mulf %155, %159 : vector<14x12xf32>
    %161 = vector.extract_strided_slice %126 {offsets = [0, 8], sizes = [12, 8], strides = [1, 1]} : vector<12x32xf32> to vector<12x8xf32>
    %cst_62 = arith.constant dense<0.000000e+00> : vector<14x8xf32>
    %162 = tpu.matmul %160, %161, %cst_62 {dimension_numbers = #tpu.dot_dimension_numbers<[1], [0], [0], [1], [0, 0, 1, 1], [], []>} : vector<14x12xf32>, vector<12x8xf32>, vector<14x8xf32> -> vector<14x8xf32>
    %163 = vector.extract_strided_slice %119 {offsets = [0, 16], sizes = [14, 8], strides = [1, 1]} : vector<14x32xf32> to vector<14x8xf32>
    %164 = vector.extract_strided_slice %125 {offsets = [0, 16], sizes = [12, 8], strides = [1, 1]} : vector<12x32xf32> to vector<12x8xf32>
    %165 = tpu.transpose %164, [1, 0] : vector<12x8xf32> -> vector<8x12xf32>
    %cst_63 = arith.constant dense<0.000000e+00> : vector<14x12xf32>
    %166 = tpu.matmul %163, %165, %cst_63 {dimension_numbers = #tpu.dot_dimension_numbers<[1], [0], [0], [1], [0, 0, 1, 1], [], []>} : vector<14x8xf32>, vector<8x12xf32>, vector<14x12xf32> -> vector<14x12xf32>
    %cst_64 = arith.constant 0.353553385 : f32
    %167 = vector.broadcast %cst_64 : f32 to vector<14x12xf32>
    %168 = arith.mulf %166, %167 : vector<14x12xf32>
    %cst_65 = arith.constant dense<0xFF800000> : vector<14xf32>
    %169 = vector.multi_reduction <maximumf>, %168, %cst_65 [1] : vector<14x12xf32> to vector<14xf32>
    %170 = vector.shape_cast %169 : vector<14xf32> to vector<14x1xf32>
    %171 = vector.broadcast %170 : vector<14x1xf32> to vector<14x12xf32>
    %172 = arith.subf %168, %171 : vector<14x12xf32>
    %173 = math.exp %172 : vector<14x12xf32>
    %cst_66 = arith.constant dense<0.000000e+00> : vector<14xf32>
    %174 = vector.multi_reduction <add>, %173, %cst_66 [1] : vector<14x12xf32> to vector<14xf32>
    %175 = vector.shape_cast %174 : vector<14xf32> to vector<14x1xf32>
    %176 = tpu.reciprocal %175 {approx = true} : vector<14x1xf32> -> vector<14x1xf32>
    %177 = vector.broadcast %176 : vector<14x1xf32> to vector<14x12xf32>
    %178 = arith.mulf %173, %177 : vector<14x12xf32>
    %179 = vector.extract_strided_slice %126 {offsets = [0, 16], sizes = [12, 8], strides = [1, 1]} : vector<12x32xf32> to vector<12x8xf32>
    %cst_67 = arith.constant dense<0.000000e+00> : vector<14x8xf32>
    %180 = tpu.matmul %178, %179, %cst_67 {dimension_numbers = #tpu.dot_dimension_numbers<[1], [0], [0], [1], [0, 0, 1, 1], [], []>} : vector<14x12xf32>, vector<12x8xf32>, vector<14x8xf32> -> vector<14x8xf32>
    %181 = vector.extract_strided_slice %119 {offsets = [0, 24], sizes = [14, 8], strides = [1, 1]} : vector<14x32xf32> to vector<14x8xf32>
    %182 = vector.extract_strided_slice %125 {offsets = [0, 24], sizes = [12, 8], strides = [1, 1]} : vector<12x32xf32> to vector<12x8xf32>
    %183 = tpu.transpose %182, [1, 0] : vector<12x8xf32> -> vector<8x12xf32>
    %cst_68 = arith.constant dense<0.000000e+00> : vector<14x12xf32>
    %184 = tpu.matmul %181, %183, %cst_68 {dimension_numbers = #tpu.dot_dimension_numbers<[1], [0], [0], [1], [0, 0, 1, 1], [], []>} : vector<14x8xf32>, vector<8x12xf32>, vector<14x12xf32> -> vector<14x12xf32>
    %cst_69 = arith.constant 0.353553385 : f32
    %185 = vector.broadcast %cst_69 : f32 to vector<14x12xf32>
    %186 = arith.mulf %184, %185 : vector<14x12xf32>
    %cst_70 = arith.constant dense<0xFF800000> : vector<14xf32>
    %187 = vector.multi_reduction <maximumf>, %186, %cst_70 [1] : vector<14x12xf32> to vector<14xf32>
    %188 = vector.shape_cast %187 : vector<14xf32> to vector<14x1xf32>
    %189 = vector.broadcast %188 : vector<14x1xf32> to vector<14x12xf32>
    %190 = arith.subf %186, %189 : vector<14x12xf32>
    %191 = math.exp %190 : vector<14x12xf32>
    %cst_71 = arith.constant dense<0.000000e+00> : vector<14xf32>
    %192 = vector.multi_reduction <add>, %191, %cst_71 [1] : vector<14x12xf32> to vector<14xf32>
    %193 = vector.shape_cast %192 : vector<14xf32> to vector<14x1xf32>
    %194 = tpu.reciprocal %193 {approx = true} : vector<14x1xf32> -> vector<14x1xf32>
    %195 = vector.broadcast %194 : vector<14x1xf32> to vector<14x12xf32>
    %196 = arith.mulf %191, %195 : vector<14x12xf32>
    %197 = vector.extract_strided_slice %126 {offsets = [0, 24], sizes = [12, 8], strides = [1, 1]} : vector<12x32xf32> to vector<12x8xf32>
    %cst_72 = arith.constant dense<0.000000e+00> : vector<14x8xf32>
    %198 = tpu.matmul %196, %197, %cst_72 {dimension_numbers = #tpu.dot_dimension_numbers<[1], [0], [0], [1], [0, 0, 1, 1], [], []>} : vector<14x12xf32>, vector<12x8xf32>, vector<14x8xf32> -> vector<14x8xf32>
    %199 = tpu.concatenate %144, %162, %180, %198 in 1 : vector<14x8xf32>, vector<14x8xf32>, vector<14x8xf32>, vector<14x8xf32> -> vector<14x32xf32>
    %c0_73 = arith.constant 0 : index
    %c0_74 = arith.constant 0 : index
    %200 = vector.load %arg11[%c0_73, %c0_74] : memref<32x32xf32, #tpu.memory_space<vmem>>, vector<32x32xf32>
    %cst_75 = arith.constant dense<0.000000e+00> : vector<14x32xf32>
    %201 = tpu.matmul %199, %200, %cst_75 {dimension_numbers = #tpu.dot_dimension_numbers<[1], [0], [0], [1], [0, 0, 1, 1], [], []>} : vector<14x32xf32>, vector<32x32xf32>, vector<14x32xf32> -> vector<14x32xf32>
    %c0_76 = arith.constant 0 : index
    %c0_77 = arith.constant 0 : index
    %202 = vector.load %arg12[%c0_76, %c0_77] : memref<1x32xf32, #tpu.memory_space<vmem>>, vector<1x32xf32>
    %203 = vector.broadcast %202 : vector<1x32xf32> to vector<14x32xf32>
    %204 = arith.addf %201, %203 : vector<14x32xf32>
    %205 = arith.addf %114, %204 : vector<14x32xf32>
    %c0_78 = arith.constant 0 : index
    %c0_79 = arith.constant 0 : index
    %206 = vector.load %arg20[%c0_78, %c0_79] : memref<1x32xf32, #tpu.memory_space<vmem>>, vector<1x32xf32>
    %c0_80 = arith.constant 0 : index
    %c0_81 = arith.constant 0 : index
    %207 = vector.load %arg21[%c0_80, %c0_81] : memref<1x32xf32, #tpu.memory_space<vmem>>, vector<1x32xf32>
    %cst_82 = arith.constant dense<0.000000e+00> : vector<14xf32>
    %208 = vector.multi_reduction <add>, %205, %cst_82 [1] : vector<14x32xf32> to vector<14xf32>
    %209 = vector.shape_cast %208 : vector<14xf32> to vector<14x1xf32>
    %cst_83 = arith.constant 3.200000e+01 : f32
    %210 = vector.broadcast %cst_83 : f32 to vector<14x1xf32>
    %211 = arith.divf %209, %210 : vector<14x1xf32>
    %212 = vector.broadcast %211 : vector<14x1xf32> to vector<14x32xf32>
    %213 = arith.subf %205, %212 : vector<14x32xf32>
    %214 = arith.mulf %213, %213 : vector<14x32xf32>
    %cst_84 = arith.constant dense<0.000000e+00> : vector<14xf32>
    %215 = vector.multi_reduction <add>, %214, %cst_84 [1] : vector<14x32xf32> to vector<14xf32>
    %216 = vector.shape_cast %215 : vector<14xf32> to vector<14x1xf32>
    %cst_85 = arith.constant 3.200000e+01 : f32
    %217 = vector.broadcast %cst_85 : f32 to vector<14x1xf32>
    %218 = arith.divf %216, %217 : vector<14x1xf32>
    %219 = vector.broadcast %211 : vector<14x1xf32> to vector<14x32xf32>
    %220 = arith.subf %205, %219 : vector<14x32xf32>
    %cst_86 = arith.constant 9.99999974E-6 : f32
    %221 = vector.broadcast %cst_86 : f32 to vector<14x1xf32>
    %222 = arith.addf %218, %221 : vector<14x1xf32>
    %223 = math.rsqrt %222 : vector<14x1xf32>
    %224 = vector.broadcast %223 : vector<14x1xf32> to vector<14x32xf32>
    %225 = arith.mulf %220, %224 : vector<14x32xf32>
    %226 = vector.broadcast %206 : vector<1x32xf32> to vector<14x32xf32>
    %227 = arith.mulf %225, %226 : vector<14x32xf32>
    %228 = vector.broadcast %207 : vector<1x32xf32> to vector<14x32xf32>
    %229 = arith.addf %227, %228 : vector<14x32xf32>
    %c0_87 = arith.constant 0 : index
    %c0_88 = arith.constant 0 : index
    %230 = vector.load %arg13[%c0_87, %c0_88] : memref<32x128xf32, #tpu.memory_space<vmem>>, vector<32x128xf32>
    %cst_89 = arith.constant dense<0.000000e+00> : vector<14x128xf32>
    %231 = tpu.matmul %229, %230, %cst_89 {dimension_numbers = #tpu.dot_dimension_numbers<[1], [0], [0], [1], [0, 0, 1, 1], [], []>} : vector<14x32xf32>, vector<32x128xf32>, vector<14x128xf32> -> vector<14x128xf32>
    %c0_90 = arith.constant 0 : index
    %c0_91 = arith.constant 0 : index
    %232 = vector.load %arg14[%c0_90, %c0_91] : memref<1x128xf32, #tpu.memory_space<vmem>>, vector<1x128xf32>
    %233 = vector.broadcast %232 : vector<1x128xf32> to vector<14x128xf32>
    %234 = arith.addf %231, %233 : vector<14x128xf32>
    %cst_92 = arith.constant 0.000000e+00 : f32
    %235 = vector.broadcast %cst_92 : f32 to vector<14x128xf32>
    %236 = arith.maximumf %234, %235 : vector<14x128xf32>
    %c0_93 = arith.constant 0 : index
    %c0_94 = arith.constant 0 : index
    %237 = vector.load %arg15[%c0_93, %c0_94] : memref<128x32xf32, #tpu.memory_space<vmem>>, vector<128x32xf32>
    %cst_95 = arith.constant dense<0.000000e+00> : vector<14x32xf32>
    %238 = tpu.matmul %236, %237, %cst_95 {dimension_numbers = #tpu.dot_dimension_numbers<[1], [0], [0], [1], [0, 0, 1, 1], [], []>} : vector<14x128xf32>, vector<128x32xf32>, vector<14x32xf32> -> vector<14x32xf32>
    %c0_96 = arith.constant 0 : index
    %c0_97 = arith.constant 0 : index
    %239 = vector.load %arg16[%c0_96, %c0_97] : memref<1x32xf32, #tpu.memory_space<vmem>>, vector<1x32xf32>
    %240 = vector.broadcast %239 : vector<1x32xf32> to vector<14x32xf32>
    %241 = arith.addf %238, %240 : vector<14x32xf32>
    %242 = arith.addf %229, %241 : vector<14x32xf32>
    %c0_98 = arith.constant 0 : index
    %c0_99 = arith.constant 0 : index
    %243 = vector.load %arg22[%c0_98, %c0_99] : memref<1x32xf32, #tpu.memory_space<vmem>>, vector<1x32xf32>
    %c0_100 = arith.constant 0 : index
    %c0_101 = arith.constant 0 : index
    %244 = vector.load %arg23[%c0_100, %c0_101] : memref<1x32xf32, #tpu.memory_space<vmem>>, vector<1x32xf32>
    %cst_102 = arith.constant dense<0.000000e+00> : vector<14xf32>
    %245 = vector.multi_reduction <add>, %242, %cst_102 [1] : vector<14x32xf32> to vector<14xf32>
    %246 = vector.shape_cast %245 : vector<14xf32> to vector<14x1xf32>
    %cst_103 = arith.constant 3.200000e+01 : f32
    %247 = vector.broadcast %cst_103 : f32 to vector<14x1xf32>
    %248 = arith.divf %246, %247 : vector<14x1xf32>
    %249 = vector.broadcast %248 : vector<14x1xf32> to vector<14x32xf32>
    %250 = arith.subf %242, %249 : vector<14x32xf32>
    %251 = arith.mulf %250, %250 : vector<14x32xf32>
    %cst_104 = arith.constant dense<0.000000e+00> : vector<14xf32>
    %252 = vector.multi_reduction <add>, %251, %cst_104 [1] : vector<14x32xf32> to vector<14xf32>
    %253 = vector.shape_cast %252 : vector<14xf32> to vector<14x1xf32>
    %cst_105 = arith.constant 3.200000e+01 : f32
    %254 = vector.broadcast %cst_105 : f32 to vector<14x1xf32>
    %255 = arith.divf %253, %254 : vector<14x1xf32>
    %256 = vector.broadcast %248 : vector<14x1xf32> to vector<14x32xf32>
    %257 = arith.subf %242, %256 : vector<14x32xf32>
    %cst_106 = arith.constant 9.99999974E-6 : f32
    %258 = vector.broadcast %cst_106 : f32 to vector<14x1xf32>
    %259 = arith.addf %255, %258 : vector<14x1xf32>
    %260 = math.rsqrt %259 : vector<14x1xf32>
    %261 = vector.broadcast %260 : vector<14x1xf32> to vector<14x32xf32>
    %262 = arith.mulf %257, %261 : vector<14x32xf32>
    %263 = vector.broadcast %243 : vector<1x32xf32> to vector<14x32xf32>
    %264 = arith.mulf %262, %263 : vector<14x32xf32>
    %265 = vector.broadcast %244 : vector<1x32xf32> to vector<14x32xf32>
    %266 = arith.addf %264, %265 : vector<14x32xf32>
    %c0_107 = arith.constant 0 : index
    %c0_108 = arith.constant 0 : index
    %267 = vector.load %arg17[%c0_107, %c0_108] : memref<14x14xf32, #tpu.memory_space<vmem>>, vector<14x14xf32>
    %cst_109 = arith.constant dense<0.000000e+00> : vector<14x32xf32>
    %268 = tpu.matmul %267, %266, %cst_109 {dimension_numbers = #tpu.dot_dimension_numbers<[1], [0], [0], [1], [0, 0, 1, 1], [], []>} : vector<14x14xf32>, vector<14x32xf32>, vector<14x32xf32> -> vector<14x32xf32>
    %c0_110 = arith.constant 0 : index
    %c0_111 = arith.constant 0 : index
    %269 = vector.load %arg24[%c0_110, %c0_111] : memref<1x32xf32, #tpu.memory_space<vmem>>, vector<1x32xf32>
    %c0_112 = arith.constant 0 : index
    %c0_113 = arith.constant 0 : index
    %270 = vector.load %arg25[%c0_112, %c0_113] : memref<1x32xf32, #tpu.memory_space<vmem>>, vector<1x32xf32>
    %cst_114 = arith.constant dense<0.000000e+00> : vector<14xf32>
    %271 = vector.multi_reduction <add>, %268, %cst_114 [1] : vector<14x32xf32> to vector<14xf32>
    %272 = vector.shape_cast %271 : vector<14xf32> to vector<14x1xf32>
    %cst_115 = arith.constant 3.200000e+01 : f32
    %273 = vector.broadcast %cst_115 : f32 to vector<14x1xf32>
    %274 = arith.divf %272, %273 : vector<14x1xf32>
    %275 = vector.broadcast %274 : vector<14x1xf32> to vector<14x32xf32>
    %276 = arith.subf %268, %275 : vector<14x32xf32>
    %277 = arith.mulf %276, %276 : vector<14x32xf32>
    %cst_116 = arith.constant dense<0.000000e+00> : vector<14xf32>
    %278 = vector.multi_reduction <add>, %277, %cst_116 [1] : vector<14x32xf32> to vector<14xf32>
    %279 = vector.shape_cast %278 : vector<14xf32> to vector<14x1xf32>
    %cst_117 = arith.constant 3.200000e+01 : f32
    %280 = vector.broadcast %cst_117 : f32 to vector<14x1xf32>
    %281 = arith.divf %279, %280 : vector<14x1xf32>
    %282 = vector.broadcast %274 : vector<14x1xf32> to vector<14x32xf32>
    %283 = arith.subf %268, %282 : vector<14x32xf32>
    %cst_118 = arith.constant 9.99999974E-6 : f32
    %284 = vector.broadcast %cst_118 : f32 to vector<14x1xf32>
    %285 = arith.addf %281, %284 : vector<14x1xf32>
    %286 = math.rsqrt %285 : vector<14x1xf32>
    %287 = vector.broadcast %286 : vector<14x1xf32> to vector<14x32xf32>
    %288 = arith.mulf %283, %287 : vector<14x32xf32>
    %289 = vector.broadcast %269 : vector<1x32xf32> to vector<14x32xf32>
    %290 = arith.mulf %288, %289 : vector<14x32xf32>
    %291 = vector.broadcast %270 : vector<1x32xf32> to vector<14x32xf32>
    %292 = arith.addf %290, %291 : vector<14x32xf32>
    %c0_119 = arith.constant 0 : index
    %c0_120 = arith.constant 0 : index
    %c0_121 = arith.constant 0 : index
    %293 = vector.load %arg26[%c0_119, %c0_120, %c0_121] : memref<1x14x32xf32, #tpu.memory_space<vmem>>, vector<1x14x32xf32>
    %294 = vector.shape_cast %293 : vector<1x14x32xf32> to vector<14x32xf32>
    %295 = vector.shape_cast %292 : vector<14x32xf32> to vector<1x14x32xf32>
    tpu.vector_store %arg26[%c0_119, %c0_120, %c0_121], %295 {strides = array<i32>} : memref<1x14x32xf32, #tpu.memory_space<vmem>>, vector<1x14x32xf32>,
    return
  }
  func.func @transform_0(%arg0: i32) -> (i32, i32, i32) {
    %c0_i32 = arith.constant 0 : i32
    %c0_i32_0 = arith.constant 0 : i32
    %c0_i32_1 = arith.constant 0 : i32
    return %arg0, %c0_i32, %c0_i32_0 : i32, i32, i32
  }
  func.func @transform_1(%arg0: i32) -> (i32, i32, i32) {
    %c0_i32 = arith.constant 0 : i32
    %c0_i32_0 = arith.constant 0 : i32
    %c0_i32_1 = arith.constant 0 : i32
    return %arg0, %c0_i32, %c0_i32_0 : i32, i32, i32
  }
  func.func @transform_2(%arg0: i32) -> (i32, i32) {
    %c0_i32 = arith.constant 0 : i32
    %c0_i32_0 = arith.constant 0 : i32
    %c0_i32_1 = arith.constant 0 : i32
    return %c0_i32, %c0_i32_0 : i32, i32
  }
  func.func @transform_3(%arg0: i32) -> (i32, i32) {
    %c0_i32 = arith.constant 0 : i32
    %c0_i32_0 = arith.constant 0 : i32
    %c0_i32_1 = arith.constant 0 : i32
    return %c0_i32, %c0_i32_0 : i32, i32
  }
  func.func @transform_4(%arg0: i32) -> (i32, i32) {
    %c0_i32 = arith.constant 0 : i32
    %c0_i32_0 = arith.constant 0 : i32
    %c0_i32_1 = arith.constant 0 : i32
    return %c0_i32, %c0_i32_0 : i32, i32
  }
  func.func @transform_5(%arg0: i32) -> (i32, i32) {
    %c0_i32 = arith.constant 0 : i32
    %c0_i32_0 = arith.constant 0 : i32
    %c0_i32_1 = arith.constant 0 : i32
    return %c0_i32, %c0_i32_0 : i32, i32
  }
  func.func @transform_6(%arg0: i32) -> (i32, i32) {
    %c0_i32 = arith.constant 0 : i32
    %c0_i32_0 = arith.constant 0 : i32
    %c0_i32_1 = arith.constant 0 : i32
    return %c0_i32, %c0_i32_0 : i32, i32
  }
  func.func @transform_7(%arg0: i32) -> (i32, i32) {
    %c0_i32 = arith.constant 0 : i32
    %c0_i32_0 = arith.constant 0 : i32
    %c0_i32_1 = arith.constant 0 : i32
    return %c0_i32, %c0_i32_0 : i32, i32
  }
  func.func @transform_8(%arg0: i32) -> (i32, i32) {
    %c0_i32 = arith.constant 0 : i32
    %c0_i32_0 = arith.constant 0 : i32
    %c0_i32_1 = arith.constant 0 : i32
    return %c0_i32, %c0_i32_0 : i32, i32
  }
  func.func @transform_9(%arg0: i32) -> (i32, i32) {
    %c0_i32 = arith.constant 0 : i32
    %c0_i32_0 = arith.constant 0 : i32
    %c0_i32_1 = arith.constant 0 : i32
    return %c0_i32, %c0_i32_0 : i32, i32
  }
  func.func @transform_10(%arg0: i32) -> (i32, i32) {
    %c0_i32 = arith.constant 0 : i32
    %c0_i32_0 = arith.constant 0 : i32
    %c0_i32_1 = arith.constant 0 : i32
    return %c0_i32, %c0_i32_0 : i32, i32
  }
  func.func @transform_11(%arg0: i32) -> (i32, i32) {
    %c0_i32 = arith.constant 0 : i32
    %c0_i32_0 = arith.constant 0 : i32
    %c0_i32_1 = arith.constant 0 : i32
    return %c0_i32, %c0_i32_0 : i32, i32
  }
  func.func @transform_12(%arg0: i32) -> (i32, i32) {
    %c0_i32 = arith.constant 0 : i32
    %c0_i32_0 = arith.constant 0 : i32
    %c0_i32_1 = arith.constant 0 : i32
    return %c0_i32, %c0_i32_0 : i32, i32
  }
  func.func @transform_13(%arg0: i32) -> (i32, i32) {
    %c0_i32 = arith.constant 0 : i32
    %c0_i32_0 = arith.constant 0 : i32
    %c0_i32_1 = arith.constant 0 : i32
    return %c0_i32, %c0_i32_0 : i32, i32
  }
  func.func @transform_14(%arg0: i32) -> (i32, i32) {
    %c0_i32 = arith.constant 0 : i32
    %c0_i32_0 = arith.constant 0 : i32
    %c0_i32_1 = arith.constant 0 : i32
    return %c0_i32, %c0_i32_0 : i32, i32
  }
  func.func @transform_15(%arg0: i32) -> (i32, i32) {
    %c0_i32 = arith.constant 0 : i32
    %c0_i32_0 = arith.constant 0 : i32
    %c0_i32_1 = arith.constant 0 : i32
    return %c0_i32, %c0_i32_0 : i32, i32
  }
  func.func @transform_16(%arg0: i32) -> (i32, i32) {
    %c0_i32 = arith.constant 0 : i32
    %c0_i32_0 = arith.constant 0 : i32
    %c0_i32_1 = arith.constant 0 : i32
    return %c0_i32, %c0_i32_0 : i32, i32
  }
  func.func @transform_17(%arg0: i32) -> (i32, i32) {
    %c0_i32 = arith.constant 0 : i32
    %c0_i32_0 = arith.constant 0 : i32
    %c0_i32_1 = arith.constant 0 : i32
    return %c0_i32, %c0_i32_0 : i32, i32
  }
  func.func @transform_18(%arg0: i32) -> (i32, i32) {
    %c0_i32 = arith.constant 0 : i32
    %c0_i32_0 = arith.constant 0 : i32
    %c0_i32_1 = arith.constant 0 : i32
    return %c0_i32, %c0_i32_0 : i32, i32
  }
  func.func @transform_19(%arg0: i32) -> (i32, i32) {
    %c0_i32 = arith.constant 0 : i32
    %c0_i32_0 = arith.constant 0 : i32
    %c0_i32_1 = arith.constant 0 : i32
    return %c0_i32, %c0_i32_0 : i32, i32
  }
  func.func @transform_20(%arg0: i32) -> (i32, i32) {
    %c0_i32 = arith.constant 0 : i32
    %c0_i32_0 = arith.constant 0 : i32
    %c0_i32_1 = arith.constant 0 : i32
    return %c0_i32, %c0_i32_0 : i32, i32
  }
  func.func @transform_21(%arg0: i32) -> (i32, i32) {
    %c0_i32 = arith.constant 0 : i32
    %c0_i32_0 = arith.constant 0 : i32
    %c0_i32_1 = arith.constant 0 : i32
    return %c0_i32, %c0_i32_0 : i32, i32
  }
  func.func @transform_22(%arg0: i32) -> (i32, i32) {
    %c0_i32 = arith.constant 0 : i32
    %c0_i32_0 = arith.constant 0 : i32
    %c0_i32_1 = arith.constant 0 : i32
    return %c0_i32, %c0_i32_0 : i32, i32
  }
  func.func @transform_23(%arg0: i32) -> (i32, i32) {
    %c0_i32 = arith.constant 0 : i32
    %c0_i32_0 = arith.constant 0 : i32
    %c0_i32_1 = arith.constant 0 : i32
    return %c0_i32, %c0_i32_0 : i32, i32
  }
  func.func @transform_24(%arg0: i32) -> (i32, i32) {
    %c0_i32 = arith.constant 0 : i32
    %c0_i32_0 = arith.constant 0 : i32
    %c0_i32_1 = arith.constant 0 : i32
    return %c0_i32, %c0_i32_0 : i32, i32
  }
  func.func @transform_25(%arg0: i32) -> (i32, i32, i32) {
    %c0_i32 = arith.constant 0 : i32
    %c0_i32_0 = arith.constant 0 : i32
    %c0_i32_1 = arith.constant 0 : i32
    return %arg0, %c0_i32, %c0_i32_0 : i32, i32, i32
  }
}

</mosaic_0001>

<bundles_post_ra>
// kernel: decoder_layer_forward.1
= control target key start
LH: loop header
LB: loop body
LE: loop exit
PB: predicated region body
PF: predicated region fallthrough
CT: control target
= control target key end

     0   :  { %s4425_s29 = smov 0   ;;  %s4943_s0 = inlined_call_operand.vmem [shape: f32[2,14,32], index: 0, kind: input, shape index: {}]   ;;  %s4944_s1 = inlined_call_operand.vmem [shape: f32[2,12,32], index: 1, kind: input, shape index: {}]   ;;  %s4945_s2 = inlined_call_operand.vmem [shape: f32[32,96], index: 2, kind: input, shape index: {}]   ;;  %s4946_s3 = inlined_call_operand.vmem [shape: f32[1,96], index: 3, kind: input, shape index: {}]   ;;  %s4947_s4 = inlined_call_operand.vmem [shape: f32[32,32], index: 4, kind: input, shape index: {}]   ;;  %s4948_s5 = inlined_call_operand.vmem [shape: f32[1,32], index: 5, kind: input, shape index: {}]   ;;  %s4949_s6 = inlined_call_operand.vmem [shape: f32[32,32], index: 6, kind: input, shape index: {}]   ;;  %s4950_s7 = inlined_call_operand.vmem [shape: f32[1,32], index: 7, kind: input, shape index: {}]   ;;  %s4951_s8 = inlined_call_operand.vmem [shape: f32[32,64], index: 8, kind: input, shape index: {}]   ;;  %s4952_s9 = inlined_call_operand.vmem [shape: f32[1,64], index: 9, kind: input, shape index: {}]   ;;  %s4953_s10 = inlined_call_operand.vmem [shape: f32[32,32], index: 10, kind: input, shape index: {}]   ;;  %s4954_s11 = inlined_call_operand.vmem [shape: f32[1,32], index: 11, kind: input, shape index: {}]   ;;  %s4955_s12 = inlined_call_operand.vmem [shape: f32[32,128], index: 12, kind: input, shape index: {}]   ;;  %s4956_s13 = inlined_call_operand.vmem [shape: f32[1,128], index: 13, kind: input, shape index: {}]   ;;  %s4957_s14 = inlined_call_operand.vmem [shape: f32[128,32], index: 14, kind: input, shape index: {}]   ;;  %s4958_s15 = inlined_call_operand.vmem [shape: f32[1,32], index: 15, kind: input, shape index: {}]   ;;  %s4959_s16 = inlined_call_operand.vmem [shape: f32[14,14], index: 16, kind: input, shape index: {}]   ;;  %s4960_s17 = inlined_call_operand.vmem [shape: f32[1,32], index: 17, kind: input, shape index: {}]   ;;  %s4961_s18 = inlined_call_operand.vmem [shape: f32[1,32], index: 18, kind: input, shape index: {}]   ;;  %s4962_s19 = inlined_call_operand.vmem [shape: f32[1,32], index: 19, kind: input, shape index: {}]   ;;  %s4963_s20 = inlined_call_operand.vmem [shape: f32[1,32], index: 20, kind: input, shape index: {}]   ;;  %s4964_s21 = inlined_call_operand.vmem [shape: f32[1,32], index: 21, kind: input, shape index: {}]   ;;  %s4965_s22 = inlined_call_operand.vmem [shape: f32[1,32], index: 22, kind: input, shape index: {}]   ;;  %s4966_s23 = inlined_call_operand.vmem [shape: f32[1,32], index: 23, kind: input, shape index: {}]   ;;  %s4967_s24 = inlined_call_operand.vmem [shape: f32[1,32], index: 24, kind: input, shape index: {}]   ;;  %s4968_s25 = inlined_call_operand.vmem [shape: f32[2,14,32], index: 25, kind: output, shape index: {}]  }
   0x1   :  { %4990 = sst [smem:[#allocation2_spill]] %s4943_s0 }
   0x2   :  { %4991 = sst [smem:[#allocation3_spill]] %s4944_s1 }
   0x3   :  { %4992 = sst [smem:[#allocation4_spill]] %s4945_s2 }
   0x4   :  { %4993 = sst [smem:[#allocation5_spill]] %s4946_s3 }
   0x5   :  { %4994 = sst [smem:[#allocation6_spill]] %s4947_s4 }
   0x6   :  { %4995 = sst [smem:[#allocation7_spill]] %s4948_s5 }
   0x7   :  { %4996 = sst [smem:[#allocation8_spill]] %s4949_s6 }
   0x8   :  { %4997 = sst [smem:[#allocation9_spill]] %s4950_s7 }
   0x9   :  { %4998 = sst [smem:[#allocation10_spill]] %s4951_s8 }
   0xa   :  { %4999 = sst [smem:[#allocation11_spill]] %s4952_s9 }
   0xb LB: > { %s3468_s2 = sadd.s32 4294967295, %s4278_s29   ;;  %p3472_p0 = scmp.ge.s32.totalorder %s4278_s29, 1  ;;  %s4278_s29 = sphi %s4425_s29, %s35_s29  }
   0xc   : > { %p697_p1 = scmp.lt.s32.totalorder %s4278_s29, 3 }
   0xe   : > { %p698_p2 = pnand %p3472_p0, %p697_p1 }
   0xf   : > { %s5000_s7 = sld [smem:[#allocation4_spill]] (!%p698_p2)  ;;  %p770_p3 = scmp.lt.s32.totalorder (!%p698_p2), %s3468_s2, 1  ;;  %vm800_vm0 = vcmask (!%p698_p2), 261120   ;;  %vm888_vm1 = vcmask (!%p698_p2), 64512   ;;  %vm978_vm3 = vcmask (!%p698_p2), 111616   ;;  %vm974_vm4 = vcmask (!%p698_p2), 113664  }
  0x10   : > { %701 = sbr.rel (%p698_p2) target bundleno = 7485 (0x1d3d), region = 120  ;;  %s5001_s0 = sld [smem:[#allocation2_spill]] (!%p698_p2)  ;;  %vm4476_vm2 = vmpackc.low (!%p698_p2), %vm888_vm1, %vm888_vm1  ;;  %vm1009_vm5 = vcmask (!%p698_p2), 1045504   ;;  %vm4284_vm6 = vmmov (!%p698_p2), 1   ;;  %vm1722_vm8 = vcmask (!%p698_p2), 130048   ;;  %vm1725_vm9 = vcmask (!%p698_p2), 195584  }
  0x11   : > { %s5002_s3 = sld [smem:[#allocation5_spill]] (!%p698_p2)  ;;  %s4981_s26 = smov (!%p698_p2), 96   ;;  %vm4494_vm7 = vmpackc.low (!%p698_p2), %vm1009_vm5, %vm4284_vm6  ;;  %vm1827_vm10 = vcmask (!%p698_p2), 259072   ;;  %vm2145_vm11 = vcmask (!%p698_p2), 95232   ;;  %vm2141_vm12 = vcmask (!%p698_p2), 97280   ;;  %vm2176_vm13 = vcmask (!%p698_p2), 1043456  }
  0x12   : > { %s4281_s1 = smov (!%p698_p2), 64   ;;  %s4986_s8 = smov (!%p698_p2), 88   ;;  %vm4714_vm14 = vmpackc.low (!%p698_p2), %vm2176_vm13, %vm4284_vm6 }
  0x13   : > { %s4987_s27 = smov (!%p698_p2), 120   ;;  %s4285_s4 = smov (!%p698_p2), 56  }
  0x14   : > { %s4980_s9 = smov (!%p698_p2), 80   ;;  %s4984_s5 = smov (!%p698_p2), 112  }
  0x15   : > { %v789_v0 = vld [vmem:[%s5000_s7] sm:$0xff] (!%p698_p2)  ;;  %v790_v1 = vld [vmem:[%s5000_s7 + $0x8] sm:$0xff] (!%p698_p2)  ;;  %v791_v2 = vld [vmem:[%s5000_s7 + $0x10] sm:$0xff] (!%p698_p2)  ;;  %s4975_s30 = smov (!%p698_p2), 8  }
  0x16   : > { %v3912_v3 = vpack.c.bf16 (!%p698_p2), %v790_v1, %v789_v0  ;;  %v792_v4 = vld [vmem:[%s5000_s7 + $0x18] sm:$0xff] (!%p698_p2) }
  0x17   : > { %v3916_v5 = vpack.c.bf16 %v792_v4, %v791_v2  ;;  %s5027_s2 = smov (!%p770_p3, %s3468_s2), 1  ;;  %v3479_v8 = vld [vmem:[%s5002_s3] ss:$0 sm:$0xff]  ;;  %s4292_s3 = smov 40  }
  0x18   : > { %3913 = vmatprep.subr.bf16.mxu1 %v3912_v3  ;;  %s4445_s28 = sshll.u32 %s5027_s2, 4  ;;  %s4290_s2 = smov 48  }
  0x19   : > { %3915 = vmatpush3.bf16.msra.mxu1 %v3912_v3  ;;  %s774_s6 = scalar_lea.vmem %s5001_s0, %s4445_s28  ;;  %s4977_s0 = smov 72  }
  0x1a   : > { %3917 = vmatprep.subr.bf16.mxu1 %v3916_v5  ;;  %v4451_v6 = vld [vmem:[%s774_s6] sm:$0xff]  ;;  %v4455_v7 = vld [vmem:[%s774_s6 + $0x8] sm:$0x3f]  ;;  %s4978_s6 = smov 104  }
  0x1b   : > { %3700 = vmatprep.mubr.msk.f32.mxu1 %vm800_vm0, %v4451_v6 }
  0x1d   : > { %3919 = vmatpush3.bf16.msra.mxu1 %v3916_v5 }
  0x20   : > { %3701 = vmatmul.mubr.msk.f32.vlgmr.msra.gmra.mrb[0].mxu1 %vm800_vm0, %v4455_v7 }
  0xf3   : > { %v3702_v9 = vpop.f32.mrb[0].mxu1 }
  0xf4   : > { %v4462_v10 = vadd.f32 %v3702_v9, %v3479_v8  ;;  %v873_v11 = vpop.f32.mrb[1].mxu1 }
  0xf5   : > { %v4464_v12 = vadd.f32 %v3479_v8, %v873_v11 }
  0xf7   : > { %3707 = vmatprep.mubr.msk.f32.mxu1 %vm888_vm1, %v4464_v12  ;;  %v4470_v13 = vpack.i.bf16 %v4462_v10, %v4464_v12 }
  0xf9   : > { %4118 = vrot.lane.b32.xlu0 %v4470_v13, %s4981_s26  ;;  %s5015_s26 = smov 88  }
 0x16b   : > { %v4119_v14 = vpop.permute.xlu0 %4118 }
 0x16c   : > { %v4121_v15 = vunpack.i.h.bf16 %v4119_v14  ;;  %v4120_v16 = vunpack.i.l.bf16 %v4119_v14 }
 0x16e   : > { %v3920_v18 = vpack.c.bf16 %v4121_v15, %v4120_v16 }
 0x170   : > { %3922 = vmatprep.subr.msk.bf16.mxu1 %vm4476_vm2, %v3920_v18 }
 0x171   : > { %3925 = vmatpush3.bf16.xpose.msk.msra.mxu1 %vm4476_vm2, %v3920_v18 }
 0x178   : > { %3708 = vmatmul.mubr.msk.f32.vlgmr.msra.gmra.mrb[2].mxu1 %vm888_vm1, %v4462_v10 }
 0x24b   : > { %v3709_v19 = vpop.f32.mrb[2].mxu1 }
 0x24c   : > { %v973_v20 = vmul.f32 0.35355338, %v3709_v19  ;;  %v963_v21 = vpop.f32.mrb[3].mxu1 }
 0x24d   : > { %v972_v22 = vmul.f32 0.35355338, %v963_v21 }
 0x24e   : > { %v979_v23 = vsel %vm978_vm3, %v973_v20, -inf }
 0x24f   : > { %980 = vmax.xlane.f32.xlu1 %v979_v23  ;;  %v975_v24 = vsel %vm974_vm4, %v972_v22, -inf }
 0x250   : > { %976 = vmax.xlane.f32.xlu0 %v975_v24 }
 0x260   : > { %4123 = vrot.lane.b32.xlu1 %v4470_v13, %s4281_s1  ;;  %s4973_s1 = smov 16  }
 0x264   : > { %4128 = vrot.lane.b32.xlu1 %v4470_v13, %s4986_s8  ;;  %s5010_s8 = sld [smem:[#allocation3_spill]] }
 0x266   : > { %1089 = vrot.lane.b32.xlu0 %v4462_v10, %s4987_s27 }
 0x2dc   : > { %v981_v25 = vpop.xlane.xlu1 %980 }
 0x2dd   : > { %v983_v26 = vsub.f32 %v973_v20, %v981_v25  ;;  %v977_v27 = vpop.xlane.xlu0 %976 }
 0x2de   : > { %v982_v28 = vsub.f32 %v972_v22, %v977_v27 }
 0x2df   : > { %v986_v29 = vmul.f32 1.442695, %v983_v26 }
 0x2e0   : > { %v984_v30 = vmul.f32 1.442695, %v982_v28  ;;  %v4124_v31 = vpop.permute.xlu1 %4123 }
 0x2e1   : > { %4192 = vpow2.f32 %v986_v29  ;;  %v4126_v32 = vunpack.i.h.bf16 %v4124_v31  ;;  %v4125_v33 = vunpack.i.l.bf16 %v4124_v31  ;;  %v1090_v51 = vpop.permute.xlu0 %1089 }
 0x2e2   : > { %4194 = vpow2.f32 %v984_v30 }
 0x2e3   : > { %v3926_v35 = vpack.c.bf16 %v4126_v32, %v4125_v33 }
 0x2e4   : > { %v4129_v36 = vpop.permute.xlu1 %4128 }
 0x2e5   : > { %v4131_v37 = vunpack.i.h.bf16 %v4129_v36  ;;  %v4130_v38 = vunpack.i.l.bf16 %v4129_v36  ;;  %3928 = vmatprep.subr.msk.bf16.mxu1 %vm4494_vm7, %v3926_v35 }
 0x2e6   : > { %3931 = vmatpush3.bf16.msk.msra.mxu1 %vm4494_vm7, %v3926_v35 }
 0x2e7   : > { %v3932_v39 = vpack.c.bf16 %v4131_v37, %v4130_v38 }
 0x2e9   : > { %3934 = vmatprep.subr.msk.bf16.mxu1 %vm4476_vm2, %v3932_v39 }
 0x2eb   : > { %v4193_v40 = vpop.eup %4192 }
 0x2ec   : > { %v991_v41 = vsel %vm978_vm3, %v4193_v40, 0.0  ;;  %v4195_v42 = vpop.eup %4194 }
 0x2ed   : > { %992 = vadd.xlane.f32.xlu1 %v991_v41  ;;  %v988_v43 = vsel %vm974_vm4, %v4195_v42, 0.0 }
 0x2f1   : > { %989 = vadd.xlane.f32.xlu1 %v988_v43 }
 0x302   : > { %1087 = vrot.lane.b32.xlu1 %v4464_v12, %s4987_s27  ;;  %s779_s27 = scalar_lea.vmem %s5010_s8, %s4445_s28  ;;  %s5013_s8 = smov 120  }
 0x37a   : > { %v993_v44 = vpop.xlane.xlu1 %992 }
 0x37b   : > { %4196 = vrcp.f32 %v993_v44 }
 0x37e   : > { %v990_v45 = vpop.xlane.xlu1 %989 }
 0x37f   : > { %4198 = vrcp.f32 %v990_v45 }
 0x382   : > { %v1088_v50 = vpop.permute.xlu1 %1087 }
 0x385   : > { %v4197_v46 = vpop.eup %4196 }
 0x386   : > { %v997_v49 = vmul.f32 %v4197_v46, %v4193_v40 }
 0x389   : > { %v4199_v47 = vpop.eup %4198 }
 0x38a   : > { %v996_v48 = vmul.f32 %v4199_v47, %v4195_v42 }
 0x38c   : > { %3714 = vmatprep.mubr.msk.f32.mxu1 %vm974_vm4, %v996_v48 }
 0x38d   : > { %3715 = vmatmul.mubr.msk.f32.vlgmr.msra.gmra.mrb[4].mxu1 %vm974_vm4, %v997_v49 }
 0x38e   : > { %3937 = vmatpush3.bf16.xpose.msk.msra.mxu1 %vm4476_vm2, %v3932_v39  ;;  %3721 = vmatprep.mubr.msk.f32.mxu1 %vm888_vm1, %v1088_v50 }
 0x395   : > { %3722 = vmatmul.mubr.msk.f32.vlgmr.msra.gmra.mrb[6].mxu1 %vm888_vm1, %v1090_v51 }
 0x460   : > { %v4514_v52 = vpop.f32.mrb[4].mxu1 }
 0x461   : > { %v4516_v53 = vpop.f32.mrb[5].mxu1 }
 0x468   : > { %v3723_v54 = vpop.f32.mrb[6].mxu1 }
 0x469   : > { %v1179_v55 = vmul.f32 0.35355338, %v3723_v54  ;;  %v1169_v56 = vpop.f32.mrb[7].mxu1 }
 0x46a   : > { %v1178_v57 = vmul.f32 0.35355338, %v1169_v56 }
 0x46b   : > { %v1183_v58 = vsel %vm978_vm3, %v1179_v55, -inf }
 0x46c   : > { %1184 = vmax.xlane.f32.xlu0 %v1183_v58  ;;  %v1180_v59 = vsel %vm974_vm4, %v1178_v57, -inf }
 0x46d   : > { %1181 = vmax.xlane.f32.xlu1 %v1180_v59 }
 0x47e   : > { %4133 = vrot.lane.b32.xlu1 %v4470_v13, %s4285_s4  ;;  %s4982_s4 = smov 24  }
 0x482   : > { %4138 = vrot.lane.b32.xlu0 %v4470_v13, %s4980_s9  ;;  %1290 = vrot.lane.b32.xlu1 %v4464_v12, %s4984_s5  ;;  %s5011_s9 = sld [smem:[#allocation8_spill]] }
 0x4f9   : > { %v1185_v60 = vpop.xlane.xlu0 %1184 }
 0x4fa   : > { %v1187_v61 = vsub.f32 %v1179_v55, %v1185_v60  ;;  %v1182_v62 = vpop.xlane.xlu1 %1181 }
 0x4fb   : > { %v1186_v63 = vsub.f32 %v1178_v57, %v1182_v62 }
 0x4fc   : > { %v1190_v0 = vmul.f32 1.442695, %v1187_v61 }
 0x4fd   : > { %v1188_v1 = vmul.f32 1.442695, %v1186_v63  ;;  %v4139_v2 = vpop.permute.xlu0 %4138 }
 0x4fe   : > { %4200 = vpow2.f32 %v1190_v0  ;;  %v4134_v3 = vpop.permute.xlu1 %4133  ;;  %v4141_v4 = vunpack.i.h.bf16 %v4139_v2  ;;  %v4140_v5 = vunpack.i.l.bf16 %v4139_v2 }
 0x4ff   : > { %v4136_v8 = vunpack.i.h.bf16 %v4134_v3  ;;  %v4135_v9 = vunpack.i.l.bf16 %v4134_v3  ;;  %4202 = vpow2.f32 %v1188_v1 }
 0x500   : > { %v3944_v14 = vpack.c.bf16 %v4141_v4, %v4140_v5 }
 0x501   : > { %v3938_v11 = vpack.c.bf16 %v4136_v8, %v4135_v9 }
 0x502   : > { %v1291_v20 = vpop.permute.xlu1 %1290 }
 0x503   : > { %3940 = vmatprep.subr.msk.bf16.mxu0 %vm4494_vm7, %v3938_v11 }
 0x504   : > { %3943 = vmatpush3.bf16.msk.msra.mxu0 %vm4494_vm7, %v3938_v11 }
 0x505   : > { %3946 = vmatprep.subr.msk.bf16.mxu0 %vm4476_vm2, %v3944_v14 }
 0x508   : > { %v4201_v15 = vpop.eup %4200 }
 0x509   : > { %v1195_v16 = vsel %vm978_vm3, %v4201_v15, 0.0  ;;  %v4203_v18 = vpop.eup %4202 }
 0x50a   : > { %1196 = vadd.xlane.f32.xlu1 %v1195_v16  ;;  %v1192_v19 = vsel %vm974_vm4, %v4203_v18, 0.0 }
 0x50e   : > { %1193 = vadd.xlane.f32.xlu1 %v1192_v19 }
 0x51f   : > { %1292 = vrot.lane.b32.xlu1 %v4462_v10, %s4984_s5  ;;  %s5017_s5 = smov 96  }
 0x597   : > { %v1197_v21 = vpop.xlane.xlu1 %1196 }
 0x598   : > { %4204 = vrcp.f32 %v1197_v21 }
 0x59b   : > { %v1194_v22 = vpop.xlane.xlu1 %1193 }
 0x59c   : > { %4206 = vrcp.f32 %v1194_v22 }
 0x59f   : > { %v1293_v27 = vpop.permute.xlu1 %1292 }
 0x5a2   : > { %v4205_v23 = vpop.eup %4204 }
 0x5a3   : > { %v1201_v26 = vmul.f32 %v4205_v23, %v4201_v15 }
 0x5a6   : > { %v4207_v24 = vpop.eup %4206 }
 0x5a7   : > { %v1200_v25 = vmul.f32 %v4207_v24, %v4203_v18 }
 0x5a9   : > { %3728 = vmatprep.mubr.msk.f32.mxu0 %vm974_vm4, %v1200_v25 }
 0x5aa   : > { %3729 = vmatmul.mubr.msk.f32.vlgmr.msra.gmra.mrb[0].mxu0 %vm974_vm4, %v1201_v26 }
 0x5ab   : > { %3949 = vmatpush3.bf16.xpose.msk.msra.mxu0 %vm4476_vm2, %v3944_v14  ;;  %3735 = vmatprep.mubr.msk.f32.mxu0 %vm888_vm1, %v1291_v20 }
 0x5b2   : > { %3736 = vmatmul.mubr.msk.f32.vlgmr.msra.gmra.mrb[2].mxu0 %vm888_vm1, %v1293_v27 }
 0x67d   : > { %v4541_v28 = vpop.f32.mrb[0].mxu0 }
 0x67e   : > { %v4543_v29 = vpop.f32.mrb[1].mxu0 }
 0x685   : > { %v3737_v30 = vpop.f32.mrb[2].mxu0 }
 0x686   : > { %v1382_v31 = vmul.f32 0.35355338, %v3737_v30  ;;  %v1372_v32 = vpop.f32.mrb[3].mxu0 }
 0x687   : > { %v1381_v33 = vmul.f32 0.35355338, %v1372_v32 }
 0x688   : > { %v1386_v35 = vsel %vm978_vm3, %v1382_v31, -inf }
 0x689   : > { %1387 = vmax.xlane.f32.xlu0 %v1386_v35  ;;  %v1383_v36 = vsel %vm974_vm4, %v1381_v33, -inf }
 0x68a   : > { %1384 = vmax.xlane.f32.xlu1 %v1383_v36 }
 0x716   : > { %v1388_v37 = vpop.xlane.xlu0 %1387 }
 0x717   : > { %v1390_v38 = vsub.f32 %v1382_v31, %v1388_v37  ;;  %v1385_v39 = vpop.xlane.xlu1 %1384 }
 0x718   : > { %v1389_v40 = vsub.f32 %v1381_v33, %v1385_v39 }
 0x719   : > { %v1393_v41 = vmul.f32 1.442695, %v1390_v38 }
 0x71a   : > { %v1391_v42 = vmul.f32 1.442695, %v1389_v40 }
 0x71b   : > { %4208 = vpow2.f32 %v1393_v41 }
 0x71c   : > { %4210 = vpow2.f32 %v1391_v42 }
 0x725   : > { %v4209_v43 = vpop.eup %4208 }
 0x726   : > { %v4211_v44 = vpop.eup %4210  ;;  %v1398_v45 = vsel %vm978_vm3, %v4209_v43, 0.0 }
 0x727   : > { %1399 = vadd.xlane.f32.xlu1 %v1398_v45  ;;  %v1395_v46 = vsel %vm974_vm4, %v4211_v44, 0.0 }
 0x728   : > { %1396 = vadd.xlane.f32.xlu0 %v1395_v46 }
 0x738   : > { %4148 = vrot.lane.b32.xlu1 %v4470_v13, %s4977_s0  ;;  %s5008_s0 = sld [smem:[#allocation7_spill]] }
 0x73c   : > { %1493 = vrot.lane.b32.xlu1 %v4464_v12, %s4978_s6 }
 0x73e   : > { %4143 = vrot.lane.b32.xlu0 %v4470_v13, %s4290_s2  ;;  %s5014_s2 = sld [smem:[#allocation9_spill]] }
 0x742   : > { %1495 = vrot.lane.b32.xlu0 %v4462_v10, %s4978_s6  ;;  %s5012_s6 = sld [smem:[#allocation11_spill]] }
 0x7b4   : > { %v1400_v47 = vpop.xlane.xlu1 %1399 }
 0x7b5   : > { %4212 = vrcp.f32 %v1400_v47  ;;  %v1397_v48 = vpop.xlane.xlu0 %1396 }
 0x7b6   : > { %4214 = vrcp.f32 %v1397_v48 }
 0x7b8   : > { %v4149_v49 = vpop.permute.xlu1 %4148 }
 0x7b9   : > { %v4144_v50 = vpop.permute.xlu0 %4143  ;;  %v4151_v51 = vunpack.i.h.bf16 %v4149_v49  ;;  %v4150_v54 = vunpack.i.l.bf16 %v4149_v49 }
 0x7ba   : > { %v4146_v55 = vunpack.i.h.bf16 %v4144_v50  ;;  %v4145_v56 = vunpack.i.l.bf16 %v4144_v50 }
 0x7bb   : > { %v3956_v58 = vpack.c.bf16 %v4151_v51, %v4150_v54 }
 0x7bc   : > { %v3950_v57 = vpack.c.bf16 %v4146_v55, %v4145_v56  ;;  %v1494_v61 = vpop.permute.xlu1 %1493 }
 0x7bd   : > { %v1496_v62 = vpop.permute.xlu0 %1495 }
 0x7be   : > { %3952 = vmatprep.subr.msk.bf16.mxu1 %vm4494_vm7, %v3950_v57 }
 0x7bf   : > { %v4213_v12 = vpop.eup %4212  ;;  %3955 = vmatpush3.bf16.msk.msra.mxu1 %vm4494_vm7, %v3950_v57 }
 0x7c0   : > { %v4215_v10 = vpop.eup %4214  ;;  %3958 = vmatprep.subr.msk.bf16.mxu1 %vm4476_vm2, %v3956_v58  ;;  %v1404_v60 = vmul.f32 %v4213_v12, %v4209_v43 }
 0x7c1   : > { %v1403_v59 = vmul.f32 %v4215_v10, %v4211_v44 }
 0x7c3   : > { %3742 = vmatprep.mubr.msk.f32.mxu1 %vm974_vm4, %v1403_v59 }
 0x7c4   : > { %3743 = vmatmul.mubr.msk.f32.vlgmr.msra.gmra.mrb[8].mxu1 %vm974_vm4, %v1404_v60 }
 0x7c5   : > { %3749 = vmatprep.mubr.msk.f32.mxu1 %vm888_vm1, %v1494_v61 }
 0x7c8   : > { %3961 = vmatpush3.bf16.xpose.msk.msra.mxu1 %vm4476_vm2, %v3956_v58 }
 0x7cf   : > { %3750 = vmatmul.mubr.msk.f32.vlgmr.msra.gmra.mrb[10].mxu1 %vm888_vm1, %v1496_v62 }
 0x897   : > { %v3744_v63 = vpop.f32.mrb[8].mxu1 }
 0x898   : > { %v1484_v0 = vpop.f32.mrb[9].mxu1 }
 0x8a2   : > { %v3751_v1 = vpop.f32.mrb[10].mxu1 }
 0x8a3   : > { %v1585_v2 = vmul.f32 0.35355338, %v3751_v1  ;;  %v1575_v3 = vpop.f32.mrb[11].mxu1 }
 0x8a4   : > { %v1584_v4 = vmul.f32 0.35355338, %v1575_v3 }
 0x8a5   : > { %v1589_v5 = vsel %vm978_vm3, %v1585_v2, -inf }
 0x8a6   : > { %1590 = vmax.xlane.f32.xlu0 %v1589_v5  ;;  %v1586_v8 = vsel %vm974_vm4, %v1584_v4, -inf }
 0x8a7   : > { %1587 = vmax.xlane.f32.xlu1 %v1586_v8 }
 0x933   : > { %v1591_v9 = vpop.xlane.xlu0 %1590 }
 0x934   : > { %v1593_v11 = vsub.f32 %v1585_v2, %v1591_v9  ;;  %v1588_v14 = vpop.xlane.xlu1 %1587 }
 0x935   : > { %v1592_v15 = vsub.f32 %v1584_v4, %v1588_v14 }
 0x936   : > { %v1596_v16 = vmul.f32 1.442695, %v1593_v11 }
 0x937   : > { %v1594_v18 = vmul.f32 1.442695, %v1592_v15  ;;  %v787_v15 = vld [vmem:[%s779_s27] sm:$0xff] }
 0x938   : > { %4216 = vpow2.f32 %v1596_v16  ;;  %v788_v16 = vld [vmem:[%s779_s27 + $0x8] sm:$0xf]  ;;  %s5023_s27 = smov 8  }
 0x939   : > { %4218 = vpow2.f32 %v1594_v18  ;;  %v1868_v18 = vld [vmem:[%s5011_s9] sm:$0xff] }
 0x942   : > { %v4217_v19 = vpop.eup %4216 }
 0x943   : > { %v4219_v20 = vpop.eup %4218  ;;  %v1601_v21 = vsel %vm978_vm3, %v4217_v19, 0.0 }
 0x944   : > { %1602 = vadd.xlane.f32.xlu1 %v1601_v21  ;;  %v1598_v22 = vsel %vm974_vm4, %v4219_v20, 0.0  ;;  %v1870_v21 = vld [vmem:[%s5011_s9 + $0x10] sm:$0xff] }
 0x945   : > { %1599 = vadd.xlane.f32.xlu0 %v1598_v22  ;;  %v1871_v22 = vld [vmem:[%s5011_s9 + $0x18] sm:$0xff] }
 0x955   : > { %1698 = vrot.lane.b32.xlu1 %v4543_v29, %s4975_s30 }
 0x959   : > { %1700 = vrot.lane.b32.xlu1 %v4541_v28, %s4975_s30  ;;  %s5024_s30 = smov 16  }
 0x95b   : > { %4153 = vrot.lane.b32.xlu0 %v4470_v13, %s4292_s3  ;;  %s5007_s3 = sld [smem:[#allocation6_spill]] }
 0x95d   : > { %1708 = vrot.lane.b32.xlu1 %v3744_v63, %s4973_s1 }
 0x95f   : > { %1706 = vrot.lane.b32.xlu0 %v1484_v0, %s4973_s1  ;;  %s5009_s1 = sld [smem:[#allocation10_spill]] }
 0x961   : > { %v1728_v32 = vld [vmem:[%s5007_s3] sm:$0xff]  ;;  %v1729_v33 = vld [vmem:[%s5007_s3 + $0x8] sm:$0xff]  ;;  %v1730_v35 = vld [vmem:[%s5007_s3 + $0x10] sm:$0xff] }
 0x962   : > { %v3968_v36 = vpack.c.bf16 %v1729_v33, %v1728_v32  ;;  %v1731_v37 = vld [vmem:[%s5007_s3 + $0x18] sm:$0xff]  ;;  %v3514_v32 = vld [vmem:[%s4961_s18] ss:$0 sm:$0xff] }
 0x963   : > { %v3972_v38 = vpack.c.bf16 %v1731_v37, %v1730_v35 }
 0x965   : > { %v1961_v5 = vld [vmem:[%s5009_s1 + $0x8] sm:$0xff]  ;;  %v1962_v9 = vld [vmem:[%s5009_s1 + $0x10] sm:$0xff]  ;;  %v1963_v11 = vld [vmem:[%s5009_s1 + $0x18] sm:$0xff] }
 0x966   : > { %v3988_v14 = vpack.c.bf16 %v1963_v11, %v1962_v9 }
 0x9d1   : > { %v1603_v23 = vpop.xlane.xlu1 %1602 }
 0x9d2   : > { %4220 = vrcp.f32 %v1603_v23  ;;  %v1600_v24 = vpop.xlane.xlu0 %1599  ;;  %v3980_v23 = vpack.c.bf16 %v1871_v22, %v1870_v21 }
 0x9d3   : > { %4222 = vrcp.f32 %v1600_v24 }
 0x9d5   : > { %v1699_v41 = vpop.permute.xlu1 %1698 }
 0x9d6   : > { %v4154_v25 = vpop.permute.xlu0 %4153  ;;  %v1720_v45 = vsel %vm888_vm1, %v4516_v53, %v1699_v41  ;;  %v3510_v53 = vld [vmem:[%s5008_s0] ss:$0 sm:$0xff]  ;;  %s5016_s0 = smov 112  }
 0x9d7   : > { %v4156_v26 = vunpack.i.h.bf16 %v4154_v25  ;;  %v4155_v27 = vunpack.i.l.bf16 %v4154_v25 }
 0x9d9   : > { %v3962_v30 = vpack.c.bf16 %v4156_v26, %v4155_v27  ;;  %v1701_v42 = vpop.permute.xlu1 %1700 }
 0x9da   : > { %v1707_v44 = vpop.permute.xlu0 %1706  ;;  %v1721_v47 = vsel %vm888_vm1, %v4514_v52, %v1701_v42 }
 0x9db   : > { %3964 = vmatprep.subr.msk.bf16.mxu0 %vm4494_vm7, %v3962_v30  ;;  %v1723_v48 = vsel %vm1722_vm8, %v1720_v45, %v1707_v44 }
 0x9dc   : > { %v4221_v28 = vpop.eup %4220  ;;  %3967 = vmatpush3.bf16.msk.msra.mxu0 %vm4494_vm7, %v3962_v30 }
 0x9dd   : > { %v4223_v13 = vpop.eup %4222  ;;  %v1607_v31 = vmul.f32 %v4221_v28, %v4217_v19  ;;  %3969 = vmatprep.subr.bf16.mxu0 %v3968_v36  ;;  %v1709_v43 = vpop.permute.xlu1 %1708  ;;  %v1869_v19 = vld [vmem:[%s5011_s9 + $0x8] sm:$0xff] }
 0x9de   : > { %v1606_v29 = vmul.f32 %v4223_v13, %v4219_v20  ;;  %v1724_v50 = vsel %vm1722_vm8, %v1721_v47, %v1709_v43  ;;  %v3976_v20 = vpack.c.bf16 %v1869_v19, %v1868_v18 }
 0x9e0   : > { %3756 = vmatprep.mubr.msk.f32.mxu0 %vm974_vm4, %v1606_v29  ;;  %3977 = vmatprep.subr.bf16.mxu1 %v3976_v20  ;;  %v3513_v29 = vld [vmem:[%s4960_s17] ss:$0 sm:$0xff] }
 0x9e1   : > { %3757 = vmatmul.mubr.msk.f32.vlgmr.msra.gmra.mrb[4].mxu0 %vm974_vm4, %v1607_v31  ;;  %3979 = vmatpush3.bf16.msra.mxu1 %v3976_v20 }
 0x9e2   : > { %3971 = vmatpush3.bf16.msra.mxu0 %v3968_v36  ;;  %3981 = vmatprep.subr.bf16.mxu1 %v3980_v23 }
 0x9e3   : > { %3973 = vmatprep.subr.bf16.mxu0 %v3972_v38 }
 0x9e5   : > { %3983 = vmatpush3.bf16.msra.mxu1 %v3980_v23 }
 0x9e6   : > { %3975 = vmatpush3.bf16.msra.mxu0 %v3972_v38 }
 0xab4   : > { %v3758_v39 = vpop.f32.mrb[4].mxu0 }
 0xab5   : > { %1716 = vrot.lane.b32.xlu1 %v3758_v39, %s4982_s4  ;;  %v1687_v40 = vpop.f32.mrb[5].mxu0 }
 0xab6   : > { %1714 = vrot.lane.b32.xlu0 %v1687_v40, %s4982_s4  ;;  %v3518_v40 = vld [vmem:[%s5012_s6] ss:$0 sm:$0xff]  ;;  %s5020_s4 = smov 80   ;;  %s5021_s6 = smov 104  }
 0xb27   : > { %v1717_v46 = vpop.permute.xlu1 %1716 }
 0xb28   : > { %v1715_v49 = vpop.permute.xlu0 %1714  ;;  %v1727_v54 = vsel %vm1725_vm9, %v1724_v50, %v1717_v46 }
 0xb29   : > { %v1726_v51 = vsel %vm1725_vm9, %v1723_v48, %v1715_v49 }
 0xb2a   : > { %3767 = vmatprep.mubr.msk.f32.mxu0 %vm800_vm0, %v1726_v51  ;;  %v3515_v51 = vld [vmem:[%s5014_s2] ss:$0 sm:$0xff] }
 0xb2b   : > { %3768 = vmatmul.mubr.msk.f32.vlgmr.msra.gmra.mrb[6].mxu0 %vm800_vm0, %v1727_v54 }
 0xb2c   : > { %3789 = vmatprep.mubr.msk.f32.mxu0 %vm800_vm0, %v787_v15 }
 0xbfe   : > { %v3769_v55 = vpop.f32.mrb[6].mxu0 }
 0xbff   : > { %v1817_v56 = vadd.f32 %v3769_v55, %v3510_v53  ;;  %v1811_v52 = vpop.f32.mrb[7].mxu0 }
 0xc00   : > { %v1812_v57 = vadd.f32 %v3510_v53, %v1811_v52 }
 0xc01   : > { %v1821_v58 = vadd.f32 %v1817_v56, %v4455_v7  ;;  %v1960_v7 = vld [vmem:[%s5009_s1] sm:$0xff] }
 0xc02   : > { %v1820_v12 = vadd.f32 %v1812_v57, %v4451_v6  ;;  %v3984_v8 = vpack.c.bf16 %v1961_v5, %v1960_v7 }
 0xc03   : > { %v1828_v10 = vsel %vm1827_vm10, %v1821_v58, 0.0 }
 0xc04   : > { %1829 = vadd.xlane.f32.xlu1 %v1828_v10  ;;  %v1824_v59 = vsel %vm800_vm0, %v1820_v12, 0.0  ;;  %3985 = vmatprep.subr.bf16.mxu0 %v3984_v8 }
 0xc05   : > { %1825 = vadd.xlane.f32.xlu0 %v1824_v59  ;;  %3987 = vmatpush3.bf16.msra.mxu0 %v3984_v8 }
 0xc06   : > { %3989 = vmatprep.subr.bf16.mxu0 %v3988_v14 }
 0xc09   : > { %3991 = vmatpush3.bf16.msra.mxu0 %v3988_v14 }
 0xc0c   : > { %3790 = vmatmul.mubr.msk.f32.vlgmr.msra.gmra.mrb[8].mxu0 %vm800_vm0, %v788_v16 }
 0xc91   : > { %v1830_v60 = vpop.xlane.xlu1 %1829 }
 0xc92   : > { %v1833_v61 = vmul.f32 0.03125, %v1830_v60  ;;  %v1826_v62 = vpop.xlane.xlu0 %1825 }
 0xc93   : > { %v1832_v63 = vmul.f32 0.03125, %v1826_v62 }
 0xc94   : > { %v1835_v0 = vsub.f32 %v1821_v58, %v1833_v61 }
 0xc95   : > { %v1834_v1 = vsub.f32 %v1820_v12, %v1832_v63 }
 0xc96   : > { %v1837_v4 = vmul.f32 %v1835_v0, %v1835_v0 }
 0xc97   : > { %v1836_v2 = vmul.f32 %v1834_v1, %v1834_v1 }
 0xc98   : > { %v1841_v6 = vsel %vm1827_vm10, %v1837_v4, 0.0 }
 0xc99   : > { %v1838_v3 = vsel %vm800_vm0, %v1836_v2, 0.0 }
 0xc9a   : > { %1839 = vadd.xlane.f32.xlu0 %v1838_v3 }
 0xc9e   : > { %1842 = vadd.xlane.f32.xlu0 %v1841_v6 }
 0xcdf   : > { %v3791_v41 = vpop.f32.mrb[8].mxu0 }
 0xce0   : > { %v2049_v42 = vadd.f32 %v3791_v41, %v3518_v40  ;;  %v2043_v43 = vpop.f32.mrb[9].mxu0 }
 0xce1   : > { %v2044_v44 = vadd.f32 %v3518_v40, %v2043_v43 }
 0xce3   : > { %v4665_v45 = vpack.i.bf16 %v2049_v42, %v2044_v44  ;;  %v3992_v46 = vpack.c.bf16 %v2049_v42, %v2044_v44 }
 0xce5   : > { %4158 = vrot.lane.b32.xlu1 %v4665_v45, %s5013_s8  ;;  %3994 = vmatprep.subr.msk.bf16.mxu1 %vm4476_vm2, %v3992_v46 }
 0xd27   : > { %v1840_v24 = vpop.xlane.xlu0 %1839 }
 0xd28   : > { %v1844_v25 = vmul.f32 0.03125, %v1840_v24 }
 0xd2a   : > { %v1846_v26 = vadd.f32 1e-05, %v1844_v25 }
 0xd2b   : > { %v1843_v27 = vpop.xlane.xlu0 %1842 }
 0xd2c   : > { %4224 = vrsqrt.f32 %v1846_v26  ;;  %v1845_v30 = vmul.f32 0.03125, %v1843_v27 }
 0xd2e   : > { %v1847_v28 = vadd.f32 1e-05, %v1845_v30 }
 0xd30   : > { %4226 = vrsqrt.f32 %v1847_v28 }
 0xd36   : > { %v4225_v13 = vpop.eup %4224 }
 0xd37   : > { %v1850_v31 = vmul.f32 %v4225_v13, %v1834_v1 }
 0xd39   : > { %v1858_v33 = vmul.f32 %v3513_v29, %v1850_v31 }
 0xd3a   : > { %v4227_v35 = vpop.eup %4226 }
 0xd3b   : > { %v1851_v36 = vmul.f32 %v4227_v35, %v1835_v0  ;;  %v4654_v37 = vadd.f32 %v3514_v32, %v1858_v33 }
 0xd3d   : > { %v1859_v38 = vmul.f32 %v3513_v29, %v1851_v36  ;;  %3778 = vmatprep.mubr.msk.f32.mxu1 %vm800_vm0, %v4654_v37 }
 0xd3f   : > { %v4658_v39 = vadd.f32 %v3514_v32, %v1859_v38 }
 0xd41   : > { %3779 = vmatmul.mubr.msk.f32.vlgmr.msra.gmra.mrb[12].mxu1 %vm800_vm0, %v4658_v39 }
 0xd42   : > { %3997 = vmatpush3.bf16.xpose.msk.msra.mxu1 %vm4476_vm2, %v3992_v46 }
 0xd57   : > { %v4159_v47 = vpop.permute.xlu1 %4158 }
 0xd58   : > { %v4161_v48 = vunpack.i.h.bf16 %v4159_v47  ;;  %v4160_v49 = vunpack.i.l.bf16 %v4159_v47 }
 0xd5a   : > { %v4004_v50 = vpack.c.bf16 %v4161_v48, %v4160_v49 }
 0xd5c   : > { %4006 = vmatprep.subr.msk.bf16.mxu1 %vm4476_vm2, %v4004_v50 }
 0xe14   : > { %v3780_v54 = vpop.f32.mrb[12].mxu1 }
 0xe15   : > { %v4678_v53 = vadd.f32 %v3780_v54, %v3515_v51  ;;  %v1951_v55 = vpop.f32.mrb[13].mxu1 }
 0xe16   : > { %v4680_v56 = vadd.f32 %v3515_v51, %v1951_v55 }
 0xe17   : > { %2256 = vrot.lane.b32.xlu1 %v4678_v53, %s5013_s8 }
 0xe18   : > { %2254 = vrot.lane.b32.xlu0 %v4680_v56, %s5013_s8  ;;  %3796 = vmatprep.mubr.msk.f32.mxu1 %vm888_vm1, %v4680_v56  ;;  %s5022_s8 = smov 72  }
 0xe19   : > { %3797 = vmatmul.mubr.msk.f32.vlgmr.msra.gmra.mrb[14].mxu1 %vm888_vm1, %v4678_v53 }
 0xe1a   : > { %4009 = vmatpush3.bf16.xpose.msk.msra.mxu1 %vm4476_vm2, %v4004_v50 }
 0xe89   : > { %v2257_v57 = vpop.permute.xlu1 %2256 }
 0xe8a   : > { %v2255_v52 = vpop.permute.xlu0 %2254 }
 0xe8b   : > { %3810 = vmatprep.mubr.msk.f32.mxu1 %vm888_vm1, %v2255_v52 }
 0xe8c   : > { %3811 = vmatmul.mubr.msk.f32.vlgmr.msra.gmra.mrb[16].mxu1 %vm888_vm1, %v2257_v57 }
 0xeec   : > { %v3798_v58 = vpop.f32.mrb[14].mxu1 }
 0xeed   : > { %v2140_v12 = vmul.f32 0.35355338, %v3798_v58  ;;  %v2130_v10 = vpop.f32.mrb[15].mxu1 }
 0xeee   : > { %v2139_v59 = vmul.f32 0.35355338, %v2130_v10 }
 0xeef   : > { %v2146_v60 = vsel %vm2145_vm11, %v2140_v12, -inf }
 0xef0   : > { %2147 = vmax.xlane.f32.xlu0 %v2146_v60  ;;  %v2142_v61 = vsel %vm2141_vm12, %v2139_v59, -inf }
 0xef1   : > { %2143 = vmax.xlane.f32.xlu1 %v2142_v61 }
 0xf5f   : > { %v3812_v62 = vpop.f32.mrb[16].mxu1 }
 0xf60   : > { %v2346_v63 = vmul.f32 0.35355338, %v3812_v62  ;;  %v2336_v0 = vpop.f32.mrb[17].mxu1 }
 0xf61   : > { %v2345_v1 = vmul.f32 0.35355338, %v2336_v0 }
 0xf62   : > { %v2350_v2 = vsel %vm2145_vm11, %v2346_v63, -inf }
 0xf63   : > { %2351 = vmax.xlane.f32.xlu1 %v2350_v2  ;;  %v2347_v3 = vsel %vm2141_vm12, %v2345_v1, -inf }
 0xf64   : > { %2348 = vmax.xlane.f32.xlu0 %v2347_v3 }
 0xf7d   : > { %v2148_v4 = vpop.xlane.xlu0 %2147 }
 0xf7e   : > { %v2150_v6 = vsub.f32 %v2140_v12, %v2148_v4  ;;  %v2144_v7 = vpop.xlane.xlu1 %2143 }
 0xf7f   : > { %v2149_v5 = vsub.f32 %v2139_v59, %v2144_v7 }
 0xf80   : > { %v2153_v8 = vmul.f32 1.442695, %v2150_v6 }
 0xf81   : > { %v2151_v9 = vmul.f32 1.442695, %v2149_v5 }
 0xf82   : > { %4228 = vpow2.f32 %v2153_v8 }
 0xf83   : > { %4230 = vpow2.f32 %v2151_v9 }
 0xf8c   : > { %v4229_v11 = vpop.eup %4228 }
 0xf8d   : > { %v4231_v14 = vpop.eup %4230  ;;  %v2158_v15 = vsel %vm2145_vm11, %v4229_v11, 0.0 }
 0xf8e   : > { %2159 = vadd.xlane.f32.xlu1 %v2158_v15  ;;  %v2155_v16 = vsel %vm2141_vm12, %v4231_v14, 0.0 }
 0xf8f   : > { %2156 = vadd.xlane.f32.xlu0 %v2155_v16 }
 0xff0   : > { %v2352_v18 = vpop.xlane.xlu1 %2351 }
 0xff1   : > { %v2354_v19 = vsub.f32 %v2346_v63, %v2352_v18  ;;  %v2349_v20 = vpop.xlane.xlu0 %2348 }
 0xff2   : > { %v2353_v21 = vsub.f32 %v2345_v1, %v2349_v20 }
 0xff3   : > { %v2357_v22 = vmul.f32 1.442695, %v2354_v19 }
 0xff4   : > { %v2355_v23 = vmul.f32 1.442695, %v2353_v21 }
 0xff5   : > { %4232 = vpow2.f32 %v2357_v22 }
 0xff6   : > { %4234 = vpow2.f32 %v2355_v23 }
 0xfff   : > { %v4233_v24 = vpop.eup %4232 }
0x1000   : > { %v4235_v25 = vpop.eup %4234  ;;  %v2362_v26 = vsel %vm2145_vm11, %v4233_v24, 0.0 }
0x1001   : > { %2363 = vadd.xlane.f32.xlu1 %v2362_v26  ;;  %v2359_v27 = vsel %vm2141_vm12, %v4235_v25, 0.0 }
0x1002   : > { %2360 = vadd.xlane.f32.xlu0 %v2359_v27 }
0x1012   : > { %4168 = vrot.lane.b32.xlu1 %v4665_v45, %s5015_s26 }
0x1016   : > { %4173 = vrot.lane.b32.xlu1 %v4665_v45, %s5016_s0 }
0x1018   : > { %4163 = vrot.lane.b32.xlu0 %v4665_v45, %s5017_s5 }
0x101a   : > { %2459 = vrot.lane.b32.xlu1 %v4678_v53, %s5016_s0 }
0x101b   : > { %v2160_v29 = vpop.xlane.xlu1 %2159 }
0x101c   : > { %2457 = vrot.lane.b32.xlu0 %v4680_v56, %s5016_s0  ;;  %v2157_v30 = vpop.xlane.xlu0 %2156 }
0x101d   : > { %4236 = vrcp.f32 %v2157_v30 }
0x101e   : > { %4238 = vrcp.f32 %v2160_v29 }
0x1027   : > { %v4237_v28 = vpop.eup %4236 }
0x1028   : > { %v2163_v13 = vmul.f32 %v4237_v28, %v4231_v14  ;;  %v4239_v46 = vpop.eup %4238 }
0x1029   : > { %v2164_v51 = vmul.f32 %v4239_v46, %v4229_v11 }
0x102a   : > { %3803 = vmatprep.mubr.msk.f32.mxu0 %vm2141_vm12, %v2163_v13 }
0x108e   : > { %v2364_v31 = vpop.xlane.xlu1 %2363 }
0x108f   : > { %v2361_v32 = vpop.xlane.xlu0 %2360 }
0x1090   : > { %4240 = vrcp.f32 %v2361_v32 }
0x1091   : > { %4242 = vrcp.f32 %v2364_v31 }
0x1092   : > { %v4169_v33 = vpop.permute.xlu1 %4168 }
0x1093   : > { %v4164_v35 = vpop.permute.xlu0 %4163  ;;  %v4171_v36 = vunpack.i.h.bf16 %v4169_v33  ;;  %v4170_v38 = vunpack.i.l.bf16 %v4169_v33 }
0x1094   : > { %v4166_v40 = vunpack.i.h.bf16 %v4164_v35  ;;  %v4165_v41 = vunpack.i.l.bf16 %v4164_v35 }
0x1095   : > { %v4010_v47 = vpack.c.bf16 %v4171_v36, %v4170_v38 }
0x1096   : > { %v3998_v43 = vpack.c.bf16 %v4166_v40, %v4165_v41  ;;  %v4174_v44 = vpop.permute.xlu1 %4173 }
0x1097   : > { %v4176_v48 = vunpack.i.h.bf16 %v4174_v44  ;;  %v4175_v49 = vunpack.i.l.bf16 %v4174_v44  ;;  %v2458_v58 = vpop.permute.xlu0 %2457 }
0x1098   : > { %4000 = vmatprep.subr.msk.bf16.mxu0 %vm4714_vm14, %v3998_v43 }
0x1099   : > { %4003 = vmatpush3.bf16.msk.msra.mxu0 %vm4714_vm14, %v3998_v43  ;;  %v4016_v52 = vpack.c.bf16 %v4176_v48, %v4175_v49 }
0x109a   : > { %v4241_v50 = vpop.eup %4240  ;;  %4012 = vmatprep.subr.msk.bf16.mxu0 %vm4714_vm14, %v4010_v47  ;;  %v2460_v12 = vpop.permute.xlu1 %2459 }
0x109b   : > { %v4243_v54 = vpop.eup %4242  ;;  %v2367_v55 = vmul.f32 %v4241_v50, %v4235_v25 }
0x109c   : > { %3804 = vmatmul.mubr.msk.f32.vlgmr.msra.gmra.mrb[10].mxu0 %vm2141_vm12, %v2164_v51  ;;  %v2368_v57 = vmul.f32 %v4243_v54, %v4233_v24 }
0x109d   : > { %4015 = vmatpush3.bf16.msk.msra.mxu0 %vm4714_vm14, %v4010_v47  ;;  %3817 = vmatprep.mubr.msk.f32.mxu0 %vm2141_vm12, %v2367_v55 }
0x109e   : > { %4018 = vmatprep.subr.msk.bf16.mxu0 %vm4476_vm2, %v4016_v52 }
0x10a0   : > { %3818 = vmatmul.mubr.msk.f32.vlgmr.msra.gmra.mrb[12].mxu0 %vm2141_vm12, %v2368_v57 }
0x10a1   : > { %3824 = vmatprep.mubr.msk.f32.mxu0 %vm888_vm1, %v2458_v58 }
0x10a6   : > { %4021 = vmatpush3.bf16.xpose.msk.msra.mxu0 %vm4476_vm2, %v4016_v52 }
0x10ad   : > { %3825 = vmatmul.mubr.msk.f32.vlgmr.msra.gmra.mrb[14].mxu0 %vm888_vm1, %v2460_v12 }
0x116f   : > { %v4735_v10 = vpop.f32.mrb[10].mxu0 }
0x1170   : > { %v4737_v59 = vpop.f32.mrb[11].mxu0 }
0x1173   : > { %v4739_v60 = vpop.f32.mrb[12].mxu0 }
0x1174   : > { %v4741_v61 = vpop.f32.mrb[13].mxu0 }
0x1180   : > { %v3826_v62 = vpop.f32.mrb[14].mxu0 }
0x1181   : > { %v2549_v63 = vmul.f32 0.35355338, %v3826_v62  ;;  %v2539_v0 = vpop.f32.mrb[15].mxu0 }
0x1182   : > { %v2548_v1 = vmul.f32 0.35355338, %v2539_v0  ;;  %v2893_v0 = vld [vmem:[%s4953_s10] sm:$0xff] }
0x1183   : > { %v2553_v2 = vsel %vm2145_vm11, %v2549_v63, -inf }
0x1184   : > { %2554 = vmax.xlane.f32.xlu1 %v2553_v2  ;;  %v2550_v3 = vsel %vm2141_vm12, %v2548_v1, -inf }
0x1185   : > { %2551 = vmax.xlane.f32.xlu0 %v2550_v3  ;;  %v2896_v3 = vld [vmem:[%s4953_s10 + $0x18] sm:$0xff] }
0x1195   : > { %4178 = vrot.lane.b32.xlu1 %v4665_v45, %s5020_s4  ;;  %s784_s4 = scalar_lea.vmem %s4968_s25, %s4445_s28 }
0x1199   : > { %2660 = vrot.lane.b32.xlu1 %v4680_v56, %s5021_s6 }
0x119d   : > { %2662 = vrot.lane.b32.xlu1 %v4678_v53, %s5021_s6 }
0x1211   : > { %v2555_v4 = vpop.xlane.xlu1 %2554 }
0x1212   : > { %v2557_v6 = vsub.f32 %v2549_v63, %v2555_v4  ;;  %v2552_v7 = vpop.xlane.xlu0 %2551 }
0x1213   : > { %v2556_v5 = vsub.f32 %v2548_v1, %v2552_v7  ;;  %v2895_v1 = vld [vmem:[%s4953_s10 + $0x10] sm:$0xff] }
0x1214   : > { %v2560_v8 = vmul.f32 1.442695, %v2557_v6  ;;  %v4044_v4 = vpack.c.bf16 %v2896_v3, %v2895_v1 }
0x1215   : > { %v2558_v9 = vmul.f32 1.442695, %v2556_v5  ;;  %v4179_v11 = vpop.permute.xlu1 %4178 }
0x1216   : > { %4244 = vpow2.f32 %v2560_v8  ;;  %v4181_v14 = vunpack.i.h.bf16 %v4179_v11  ;;  %v4180_v15 = vunpack.i.l.bf16 %v4179_v11 }
0x1217   : > { %4246 = vpow2.f32 %v2558_v9 }
0x1218   : > { %v4022_v16 = vpack.c.bf16 %v4181_v14, %v4180_v15 }
0x1219   : > { %v2661_v13 = vpop.permute.xlu1 %2660 }
0x121a   : > { %4024 = vmatprep.subr.msk.bf16.mxu1 %vm4714_vm14, %v4022_v16 }
0x121b   : > { %4027 = vmatpush3.bf16.msk.msra.mxu1 %vm4714_vm14, %v4022_v16 }
0x121d   : > { %v2663_v29 = vpop.permute.xlu1 %2662 }
0x1220   : > { %v4245_v56 = vpop.eup %4244 }
0x1221   : > { %v2565_v53 = vsel %vm2145_vm11, %v4245_v56, 0.0  ;;  %v4247_v18 = vpop.eup %4246 }
0x1222   : > { %2566 = vadd.xlane.f32.xlu0 %v2565_v53  ;;  %v2562_v19 = vsel %vm2141_vm12, %v4247_v18, 0.0 }
0x1226   : > { %2563 = vadd.xlane.f32.xlu0 %v2562_v19 }
0x123c   : > { %4183 = vrot.lane.b32.xlu0 %v4665_v45, %s5021_s6 }
0x12af   : > { %v2567_v20 = vpop.xlane.xlu0 %2566 }
0x12b0   : > { %4248 = vrcp.f32 %v2567_v20 }
0x12b3   : > { %v2564_v21 = vpop.xlane.xlu0 %2563 }
0x12b4   : > { %4250 = vrcp.f32 %v2564_v21 }
0x12b7   : > { %v4184_v22 = vpop.permute.xlu0 %4183 }
0x12b8   : > { %v4186_v23 = vunpack.i.h.bf16 %v4184_v22  ;;  %v4185_v24 = vunpack.i.l.bf16 %v4184_v22 }
0x12ba   : > { %v4028_v25 = vpack.c.bf16 %v4186_v23, %v4185_v24  ;;  %v4249_v26 = vpop.eup %4248 }
0x12bb   : > { %v2571_v28 = vmul.f32 %v4249_v26, %v4245_v56 }
0x12bc   : > { %4030 = vmatprep.subr.msk.bf16.mxu1 %vm4476_vm2, %v4028_v25 }
0x12be   : > { %v4251_v27 = vpop.eup %4250 }
0x12bf   : > { %v2570_v30 = vmul.f32 %v4251_v27, %v4247_v18 }
0x12c1   : > { %3831 = vmatprep.mubr.msk.f32.mxu1 %vm2141_vm12, %v2570_v30 }
0x12c2   : > { %3832 = vmatmul.mubr.msk.f32.vlgmr.msra.gmra.mrb[18].mxu1 %vm2141_vm12, %v2571_v28 }
0x12c3   : > { %4033 = vmatpush3.bf16.xpose.msk.msra.mxu1 %vm4476_vm2, %v4028_v25  ;;  %3838 = vmatprep.mubr.msk.f32.mxu1 %vm888_vm1, %v2661_v13 }
0x12ca   : > { %3839 = vmatmul.mubr.msk.f32.vlgmr.msra.gmra.mrb[20].mxu1 %vm888_vm1, %v2663_v29 }
0x1395   : > { %v3833_v31 = vpop.f32.mrb[18].mxu1 }
0x1396   : > { %v2651_v32 = vpop.f32.mrb[19].mxu1 }
0x139d   : > { %v3840_v33 = vpop.f32.mrb[20].mxu1 }
0x139e   : > { %v2752_v35 = vmul.f32 0.35355338, %v3840_v33  ;;  %v2742_v36 = vpop.f32.mrb[21].mxu1 }
0x139f   : > { %v2751_v38 = vmul.f32 0.35355338, %v2742_v36  ;;  %v3031_v36 = vld [vmem:[%s4955_s12] sm:$0xff] }
0x13a0   : > { %v2756_v40 = vsel %vm2145_vm11, %v2752_v35, -inf }
0x13a1   : > { %2757 = vmax.xlane.f32.xlu1 %v2756_v40  ;;  %v2753_v41 = vsel %vm2141_vm12, %v2751_v38, -inf }
0x13a2   : > { %2754 = vmax.xlane.f32.xlu0 %v2753_v41  ;;  %v3033_v41 = vld [vmem:[%s4955_s12 + $0x10] sm:$0xff] }
0x13b2   : > { %4188 = vrot.lane.b32.xlu1 %v4665_v45, %s5022_s8 }
0x13b6   : > { %2867 = vrot.lane.b32.xlu1 %v4739_v60, %s5023_s27 }
0x13ba   : > { %2873 = vrot.lane.b32.xlu1 %v2651_v32, %s5024_s30 }
0x142e   : > { %v2758_v17 = vpop.xlane.xlu1 %2757 }
0x142f   : > { %v2760_v43 = vsub.f32 %v2752_v35, %v2758_v17  ;;  %v2755_v44 = vpop.xlane.xlu0 %2754  ;;  %v3034_v17 = vld [vmem:[%s4955_s12 + $0x18] sm:$0xff] }
0x1430   : > { %v2759_v46 = vsub.f32 %v2751_v38, %v2755_v44  ;;  %v3032_v38 = vld [vmem:[%s4955_s12 + $0x8] sm:$0xff]  ;;  %v3125_v44 = vld [vmem:[%s4957_s14] sm:$0xff] }
0x1431   : > { %v2763_v47 = vmul.f32 1.442695, %v2760_v43  ;;  %v4048_v40 = vpack.c.bf16 %v3032_v38, %v3031_v36  ;;  %v4052_v43 = vpack.c.bf16 %v3034_v17, %v3033_v41 }
0x1432   : > { %v2761_v48 = vmul.f32 1.442695, %v2759_v46  ;;  %v4189_v49 = vpop.permute.xlu1 %4188  ;;  %v3126_v46 = vld [vmem:[%s4957_s14 + $0x8] sm:$0xff] }
0x1433   : > { %v4191_v50 = vunpack.i.h.bf16 %v4189_v49  ;;  %v4190_v51 = vunpack.i.l.bf16 %v4189_v49  ;;  %4049 = vmatprep.subr.bf16.mxu1 %v4048_v40  ;;  %v3128_v49 = vld [vmem:[%s4957_s14 + $0x18] sm:$0xff] }
0x1434   : > { %4252 = vpow2.f32 %v2761_v48  ;;  %4051 = vmatpush3.bf16.msra.mxu1 %v4048_v40  ;;  %v4056_v48 = vpack.c.bf16 %v3126_v46, %v3125_v44 }
0x1435   : > { %v4034_v54 = vpack.c.bf16 %v4191_v50, %v4190_v51  ;;  %4254 = vpow2.f32 %v2763_v47  ;;  %4053 = vmatprep.subr.bf16.mxu1 %v4052_v43  ;;  %v3127_v47 = vld [vmem:[%s4957_s14 + $0x10] sm:$0xff]  ;;  %v3129_v51 = vld [vmem:[%s4957_s14 + $0x20] sm:$0xff] }
0x1436   : > { %v2868_v8 = vpop.permute.xlu1 %2867  ;;  %v4060_v50 = vpack.c.bf16 %v3128_v49, %v3127_v47 }
0x1437   : > { %4036 = vmatprep.subr.msk.bf16.mxu0 %vm4714_vm14, %v4034_v54  ;;  %v2888_v16 = vsel %vm888_vm1, %v4735_v10, %v2868_v8 }
0x1438   : > { %4039 = vmatpush3.bf16.msk.msra.mxu0 %vm4714_vm14, %v4034_v54  ;;  %4055 = vmatpush3.bf16.msra.mxu1 %v4052_v43  ;;  %v3130_v54 = vld [vmem:[%s4957_s14 + $0x28] sm:$0xff] }
0x143a   : > { %v2874_v11 = vpop.permute.xlu1 %2873 }
0x143e   : > { %v4253_v45 = vpop.eup %4252 }
0x143f   : > { %v2765_v55 = vsel %vm2141_vm12, %v4253_v45, 0.0  ;;  %v4255_v52 = vpop.eup %4254 }
0x1440   : > { %2766 = vadd.xlane.f32.xlu0 %v2765_v55  ;;  %v2768_v57 = vsel %vm2145_vm11, %v4255_v52, 0.0  ;;  %v3131_v55 = vld [vmem:[%s4957_s14 + $0x30] sm:$0xff] }
0x1444   : > { %2769 = vadd.xlane.f32.xlu0 %v2768_v57 }
0x145a   : > { %2865 = vrot.lane.b32.xlu0 %v4741_v61, %s5023_s27  ;;  %v2894_v61 = vld [vmem:[%s4953_s10 + $0x8] sm:$0xff] }
0x145b   : > { %v4040_v2 = vpack.c.bf16 %v2894_v61, %v2893_v0  ;;  %v3137_v0 = vld [vmem:[%s4957_s14 + $0x60] sm:$0xff]  ;;  %v3138_v61 = vld [vmem:[%s4957_s14 + $0x68] sm:$0xff] }
0x145c   : > { %v4080_v1 = vpack.c.bf16 %v3138_v61, %v3137_v0 }
0x145d   : > { %4041 = vmatprep.subr.bf16.mxu0 %v4040_v2 }
0x145e   : > { %2875 = vrot.lane.b32.xlu0 %v3833_v31, %s5024_s30  ;;  %s5025_s30 = smov 24  }
0x14cd   : > { %v2767_v58 = vpop.xlane.xlu0 %2766 }
0x14ce   : > { %4256 = vrcp.f32 %v2767_v58  ;;  %v3133_v58 = vld [vmem:[%s4957_s14 + $0x40] sm:$0xff] }
0x14d1   : > { %v2770_v12 = vpop.xlane.xlu0 %2769 }
0x14d2   : > { %4258 = vrcp.f32 %v2770_v12  ;;  %v3134_v12 = vld [vmem:[%s4957_s14 + $0x48] sm:$0xff] }
0x14d5   : > { %v2866_v5 = vpop.permute.xlu0 %2865 }
0x14d6   : > { %v2887_v14 = vsel %vm888_vm1, %v4737_v59, %v2866_v5  ;;  %v3549_v59 = vld [vmem:[%s4954_s11] ss:$0 sm:$0xff] }
0x14d7   : > { %v2889_v53 = vsel %vm1722_vm8, %v2887_v14, %v2874_v11 }
0x14d8   : > { %v4257_v60 = vpop.eup %4256 }
0x14d9   : > { %v2773_v42 = vmul.f32 %v4257_v60, %v4253_v45  ;;  %v2876_v9 = vpop.permute.xlu0 %2875  ;;  %v4064_v45 = vpack.c.bf16 %v3130_v54, %v3129_v51  ;;  %v4072_v60 = vpack.c.bf16 %v3134_v12, %v3133_v58 }
0x14da   : > { %v2890_v18 = vsel %vm1722_vm8, %v2888_v16, %v2876_v9  ;;  %v3552_v9 = vld [vmem:[%s4962_s19] ss:$0 sm:$0xff] }
0x14db   : > { %3845 = vmatprep.mubr.msk.f32.mxu0 %vm2141_vm12, %v2773_v42  ;;  %v3135_v42 = vld [vmem:[%s4957_s14 + $0x50] sm:$0xff]  ;;  %v3553_v16 = vld [vmem:[%s4963_s20] ss:$0 sm:$0xff] }
0x14dc   : > { %v4259_v62 = vpop.eup %4258 }
0x14dd   : > { %v2774_v63 = vmul.f32 %v4259_v62, %v4255_v52  ;;  %v3132_v52 = vld [vmem:[%s4957_s14 + $0x38] sm:$0xff] }
0x14de   : > { %v4068_v57 = vpack.c.bf16 %v3132_v52, %v3131_v55  ;;  %v3136_v62 = vld [vmem:[%s4957_s14 + $0x58] sm:$0xff] }
0x14df   : > { %3846 = vmatmul.mubr.msk.f32.vlgmr.msra.gmra.mrb[16].mxu0 %vm2141_vm12, %v2774_v63  ;;  %v4076_v63 = vpack.c.bf16 %v3136_v62, %v3135_v42  ;;  %v3559_v42 = vld [vmem:[%s4965_s22] ss:$0 sm:$0xff] }
0x14e0   : > { %4043 = vmatpush3.bf16.msra.mxu0 %v4040_v2 }
0x14e1   : > { %4045 = vmatprep.subr.bf16.mxu0 %v4044_v4 }
0x14e4   : > { %4047 = vmatpush3.bf16.msra.mxu0 %v4044_v4 }
0x14e5   : > { %4057 = vmatprep.subr.bf16.mxu0 %v4056_v48 }
0x15b2   : > { %v3847_v6 = vpop.f32.mrb[16].mxu0 }
0x15b3   : > { %2883 = vrot.lane.b32.xlu0 %v3847_v6, %s5025_s30  ;;  %v2854_v7 = vpop.f32.mrb[17].mxu0 }
0x15b4   : > { %2881 = vrot.lane.b32.xlu1 %v2854_v7, %s5025_s30 }
0x1625   : > { %v2884_v15 = vpop.permute.xlu0 %2883 }
0x1626   : > { %v2882_v56 = vpop.permute.xlu1 %2881  ;;  %v2892_v20 = vsel %vm1725_vm9, %v2890_v18, %v2884_v15 }
0x1627   : > { %v2891_v19 = vsel %vm1725_vm9, %v2889_v53, %v2882_v56 }
0x1628   : > { %3856 = vmatprep.mubr.msk.f32.mxu0 %vm800_vm0, %v2891_v19 }
0x1629   : > { %3857 = vmatmul.mubr.msk.f32.vlgmr.msra.gmra.mrb[18].mxu0 %vm800_vm0, %v2892_v20  ;;  %v3139_v20 = vld [vmem:[%s4957_s14 + $0x70] sm:$0xff] }
0x162a   : > { %4059 = vmatpush3.bf16.msra.mxu0 %v4056_v48  ;;  %v3269_v48 = vld [vmem:[%s4959_s16] sm:$0xff] }
0x162b   : > { %4061 = vmatprep.subr.bf16.mxu0 %v4060_v50 }
0x162e   : > { %4063 = vmatpush3.bf16.msra.mxu0 %v4060_v50 }
0x162f   : > { %4065 = vmatprep.subr.bf16.mxu0 %v4064_v45 }
0x1632   : > { %4067 = vmatpush3.bf16.msra.mxu0 %v4064_v45 }
0x1633   : > { %4069 = vmatprep.subr.bf16.mxu0 %v4068_v57 }
0x1636   : > { %4071 = vmatpush3.bf16.msra.mxu0 %v4068_v57  ;;  %v3558_v57 = vld [vmem:[%s4964_s21] ss:$0 sm:$0xff] }
0x1637   : > { %4073 = vmatprep.subr.bf16.mxu0 %v4072_v60 }
0x163a   : > { %4075 = vmatpush3.bf16.msra.mxu0 %v4072_v60 }
0x163b   : > { %4077 = vmatprep.subr.bf16.mxu0 %v4076_v63 }
0x163e   : > { %4079 = vmatpush3.bf16.msra.mxu0 %v4076_v63 }
0x163f   : > { %4081 = vmatprep.subr.bf16.mxu0 %v4080_v1 }
0x1642   : > { %4083 = vmatpush3.bf16.msra.mxu0 %v4080_v1 }
0x16fc   : > { %v3858_v21 = vpop.f32.mrb[18].mxu0 }
0x16fd   : > { %v2982_v22 = vadd.f32 %v3858_v21, %v3549_v59  ;;  %v2976_v10 = vpop.f32.mrb[19].mxu0 }
0x16fe   : > { %v2977_v23 = vadd.f32 %v3549_v59, %v2976_v10  ;;  %v3140_v59 = vld [vmem:[%s4957_s14 + $0x78] sm:$0xff] }
0x16ff   : > { %v2986_v24 = vadd.f32 %v2982_v22, %v4658_v39  ;;  %v4084_v21 = vpack.c.bf16 %v3140_v59, %v3139_v20  ;;  %v3554_v22 = vld [vmem:[%s4956_s13] ss:$0 sm:$0xff] }
0x1700   : > { %v2985_v25 = vadd.f32 %v2977_v23, %v4654_v37 }
0x1701   : > { %v2992_v26 = vsel %vm1827_vm10, %v2986_v24, 0.0  ;;  %4085 = vmatprep.subr.bf16.mxu0 %v4084_v21 }
0x1702   : > { %2993 = vadd.xlane.f32.xlu0 %v2992_v26  ;;  %v2989_v27 = vsel %vm800_vm0, %v2985_v25, 0.0  ;;  %4087 = vmatpush3.bf16.msra.mxu0 %v4084_v21 }
0x1703   : > { %2990 = vadd.xlane.f32.xlu1 %v2989_v27 }
0x178f   : > { %v2994_v30 = vpop.xlane.xlu0 %2993 }
0x1790   : > { %v2996_v28 = vmul.f32 0.03125, %v2994_v30  ;;  %v2991_v13 = vpop.xlane.xlu1 %2990  ;;  %v3557_v30 = vld [vmem:[%s4958_s15] ss:$0 sm:$0xff] }
0x1791   : > { %v2995_v29 = vmul.f32 0.03125, %v2991_v13 }
0x1792   : > { %v4816_v31 = vsub.f32 %v2986_v24, %v2996_v28 }
0x1793   : > { %v4818_v32 = vsub.f32 %v2985_v25, %v2995_v29 }
0x1794   : > { %v3000_v33 = vmul.f32 %v4816_v31, %v4816_v31 }
0x1795   : > { %v2999_v37 = vmul.f32 %v4818_v32, %v4818_v32 }
0x1796   : > { %v3004_v39 = vsel %vm1827_vm10, %v3000_v33, 0.0 }
0x1797   : > { %3005 = vadd.xlane.f32.xlu1 %v3004_v39  ;;  %v3001_v35 = vsel %vm800_vm0, %v2999_v37, 0.0 }
0x1798   : > { %3002 = vadd.xlane.f32.xlu0 %v3001_v35 }
0x1824   : > { %v3006_v2 = vpop.xlane.xlu1 %3005 }
0x1825   : > { %v3008_v3 = vmul.f32 0.03125, %v3006_v2  ;;  %v3003_v4 = vpop.xlane.xlu0 %3002  ;;  %v3270_v2 = vld [vmem:[%s4959_s16 + $0x8] sm:$0x3f] }
0x1826   : > { %v3007_v6 = vmul.f32 0.03125, %v3003_v4 }
0x1827   : > { %v3010_v7 = vadd.f32 1e-05, %v3008_v3 }
0x1828   : > { %v3009_v5 = vadd.f32 1e-05, %v3007_v6 }
0x1829   : > { %4260 = vrsqrt.f32 %v3010_v7 }
0x182a   : > { %4262 = vrsqrt.f32 %v3009_v5 }
0x1833   : > { %v4261_v8 = vpop.eup %4260 }
0x1834   : > { %v4263_v11 = vpop.eup %4262  ;;  %v3014_v14 = vmul.f32 %v4261_v8, %v4816_v31 }
0x1835   : > { %v3013_v15 = vmul.f32 %v4263_v11, %v4818_v32 }
0x1836   : > { %v3022_v56 = vmul.f32 %v3552_v9, %v3014_v14 }
0x1837   : > { %v3021_v53 = vmul.f32 %v3552_v9, %v3013_v15 }
0x1838   : > { %v3030_v19 = vadd.f32 %v3553_v16, %v3022_v56 }
0x1839   : > { %v3029_v18 = vadd.f32 %v3553_v16, %v3021_v53 }
0x183b   : > { %3867 = vmatprep.mubr.msk.f32.mxu1 %vm800_vm0, %v3029_v18 }
0x183c   : > { %3868 = vmatmul.mubr.msk.f32.vlgmr.msra.gmra.mrb[22].mxu1 %vm800_vm0, %v3030_v19 }
0x183d   : > { %3909 = vmatprep.mubr.msk.f32.mxu1 %vm974_vm4, %v3269_v48 }
0x190f   : > { %v3869_v10 = vpop.f32.mrb[22].mxu1 }
0x1910   : > { %v3120_v23 = vadd.f32 %v3869_v10, %v3554_v22  ;;  %v3114_v24 = vpop.f32.mrb[23].mxu1 }
0x1911   : > { %v3115_v25 = vadd.f32 %v3554_v22, %v3114_v24 }
0x1912   : > { %v3124_v27 = vmax.f32 %v3120_v23, 0.0  ;;  %v3563_v23 = vld [vmem:[%s4966_s23] ss:$0 sm:$0xff] }
0x1913   : > { %v3123_v26 = vmax.f32 %v3115_v25, 0.0 }
0x1915   : > { %3902 = vmatprep.mubr.f32.mxu0 %v3123_v26  ;;  %v3564_v26 = vld [vmem:[%s4967_s24] ss:$0 sm:$0xff] }
0x1916   : > { %3903 = vmatmul.mubr.f32.vlgmr.msra.gmra.mrb[20].mxu0 %v3124_v27 }
0x19e9   : > { %v3904_v28 = vpop.f32.mrb[20].mxu0 }
0x19ea   : > { %v3220_v13 = vadd.f32 %v3904_v28, %v3557_v30  ;;  %v3214_v29 = vpop.f32.mrb[21].mxu0 }
0x19eb   : > { %v3215_v31 = vadd.f32 %v3557_v30, %v3214_v29 }
0x19ec   : > { %v3224_v32 = vadd.f32 %v3220_v13, %v3030_v19 }
0x19ed   : > { %v3223_v33 = vadd.f32 %v3215_v31, %v3029_v18 }
0x19ee   : > { %v3230_v37 = vsel %vm1827_vm10, %v3224_v32, 0.0 }
0x19ef   : > { %3231 = vadd.xlane.f32.xlu1 %v3230_v37  ;;  %v3227_v39 = vsel %vm800_vm0, %v3223_v33, 0.0 }
0x19f0   : > { %3228 = vadd.xlane.f32.xlu0 %v3227_v39 }
0x1a7c   : > { %v3232_v35 = vpop.xlane.xlu1 %3231 }
0x1a7d   : > { %v3234_v36 = vmul.f32 0.03125, %v3232_v35  ;;  %v3229_v38 = vpop.xlane.xlu0 %3228 }
0x1a7e   : > { %v3233_v40 = vmul.f32 0.03125, %v3229_v38 }
0x1a7f   : > { %v3236_v41 = vsub.f32 %v3224_v32, %v3234_v36 }
0x1a80   : > { %v3235_v17 = vsub.f32 %v3223_v33, %v3233_v40 }
0x1a81   : > { %v3238_v43 = vmul.f32 %v3236_v41, %v3236_v41 }
0x1a82   : > { %v3237_v44 = vmul.f32 %v3235_v17, %v3235_v17 }
0x1a83   : > { %v3242_v46 = vsel %vm1827_vm10, %v3238_v43, 0.0 }
0x1a84   : > { %3243 = vadd.xlane.f32.xlu1 %v3242_v46  ;;  %v3239_v47 = vsel %vm800_vm0, %v3237_v44, 0.0 }
0x1a85   : > { %3240 = vadd.xlane.f32.xlu0 %v3239_v47 }
0x1b11   : > { %v3244_v49 = vpop.xlane.xlu1 %3243 }
0x1b12   : > { %v3246_v50 = vmul.f32 0.03125, %v3244_v49  ;;  %v3241_v51 = vpop.xlane.xlu0 %3240 }
0x1b13   : > { %v3245_v54 = vmul.f32 0.03125, %v3241_v51 }
0x1b14   : > { %v3248_v45 = vadd.f32 1e-05, %v3246_v50 }
0x1b15   : > { %v3247_v55 = vadd.f32 1e-05, %v3245_v54 }
0x1b16   : > { %4264 = vrsqrt.f32 %v3248_v45 }
0x1b17   : > { %4266 = vrsqrt.f32 %v3247_v55 }
0x1b20   : > { %v4265_v52 = vpop.eup %4264 }
0x1b21   : > { %v4267_v58 = vpop.eup %4266  ;;  %v3252_v12 = vmul.f32 %v4265_v52, %v3236_v41 }
0x1b22   : > { %v3251_v60 = vmul.f32 %v4267_v58, %v3235_v17 }
0x1b23   : > { %v3260_v62 = vmul.f32 %v3558_v57, %v3252_v12 }
0x1b24   : > { %v3259_v63 = vmul.f32 %v3558_v57, %v3251_v60 }
0x1b25   : > { %v3268_v0 = vadd.f32 %v3559_v42, %v3260_v62 }
0x1b26   : > { %v3267_v61 = vadd.f32 %v3559_v42, %v3259_v63 }
0x1b28   : > { %v4088_v1 = vpack.c.bf16 %v3268_v0, %v3267_v61 }
0x1b2a   : > { %4090 = vmatprep.subr.msk.bf16.mxu1 %vm4494_vm7, %v4088_v1 }
0x1b2b   : > { %4093 = vmatpush3.bf16.msk.msra.mxu1 %vm4494_vm7, %v4088_v1 }
0x1b2e   : > { %3910 = vmatmul.mubr.msk.f32.vlgmr.msra.gmra.mrb[24].mxu1 %vm974_vm4, %v3270_v2 }
0x1c01   : > { %v3911_v3 = vpop.f32.mrb[24].mxu1 }
0x1c02   : > { %v3346_v4 = vpop.f32.mrb[25].mxu1  ;;  %v3360_v6 = vsel %vm1827_vm10, %v3911_v3, 0.0 }
0x1c03   : > { %3361 = vadd.xlane.f32.xlu1 %v3360_v6  ;;  %v3357_v7 = vsel %vm800_vm0, %v3346_v4, 0.0 }
0x1c04   : > { %3358 = vadd.xlane.f32.xlu0 %v3357_v7 }
0x1c90   : > { %v3362_v5 = vpop.xlane.xlu1 %3361 }
0x1c91   : > { %v3364_v8 = vmul.f32 0.03125, %v3362_v5  ;;  %v3359_v9 = vpop.xlane.xlu0 %3358 }
0x1c92   : > { %v3363_v11 = vmul.f32 0.03125, %v3359_v9 }
0x1c93   : > { %v3366_v34 = vsub.f32 %v3911_v3, %v3364_v8 }
0x1c94   : > { %v3365_v14 = vsub.f32 %v3346_v4, %v3363_v11 }
0x1c95   : > { %v3368_v15 = vmul.f32 %v3366_v34, %v3366_v34 }
0x1c96   : > { %v3367_v16 = vmul.f32 %v3365_v14, %v3365_v14 }
0x1c97   : > { %v3372_v56 = vsel %vm1827_vm10, %v3368_v15, 0.0 }
0x1c98   : > { %3373 = vadd.xlane.f32.xlu1 %v3372_v56  ;;  %v3369_v53 = vsel %vm800_vm0, %v3367_v16, 0.0 }
0x1c99   : > { %3370 = vadd.xlane.f32.xlu0 %v3369_v53 }
0x1d25   : > { %v3374_v18 = vpop.xlane.xlu1 %3373 }
0x1d26   : > { %v3376_v19 = vmul.f32 0.03125, %v3374_v18  ;;  %v3371_v20 = vpop.xlane.xlu0 %3370 }
0x1d27   : > { %v3375_v59 = vmul.f32 0.03125, %v3371_v20 }
0x1d28   : > { %v3378_v21 = vadd.f32 1e-05, %v3376_v19 }
0x1d29   : > { %v3377_v22 = vadd.f32 1e-05, %v3375_v59 }
0x1d2a   : > { %4268 = vrsqrt.f32 %v3378_v21 }
0x1d2b   : > { %4270 = vrsqrt.f32 %v3377_v22 }
0x1d34   : > { %v4269_v10 = vpop.eup %4268 }
0x1d35   : > { %v4271_v24 = vpop.eup %4270  ;;  %v3382_v25 = vmul.f32 %v4269_v10, %v3366_v34 }
0x1d36   : > { %v3381_v27 = vmul.f32 %v4271_v24, %v3365_v14 }
0x1d37   : > { %v3390_v30 = vmul.f32 %v3563_v23, %v3382_v25 }
0x1d38   : > { %v3389_v28 = vmul.f32 %v3563_v23, %v3381_v27 }
0x1d39   : > { %v3398_v13 = vadd.f32 %v3564_v26, %v3390_v30 }
0x1d3a   : > { %v3397_v29 = vadd.f32 %v3564_v26, %v3389_v28 }
0x1d3b   : > { %3400 = vst.msk [vmem:[%s784_s4 + $0x8] sm:$0x3f] %vm1827_vm10, %v3398_v13 }
0x1d3c   : > { %3399 = vst.msk [vmem:[%s784_s4] sm:$0xff] %vm800_vm0, %v3397_v29 }
0x1d3d PF: > { %s35_s29 = sadd.s32 1, %s4278_s29  }
0x1d3e   : > { %p32_p4 = scmp.ge.s32.totalorder %s35_s29, 4  }
0x1d40   :  { %34 = sbr.rel (!%p32_p4) target bundleno = 11 (0xb), region = 153 }

</bundles_post_ra>
